<compile_context>
chip_gen: v6e
topology: v6e:2x2x1
jax: 0.10.0
libtpu: 0.0.40
codegen_flags: <defaults>
</compile_context>

<pallas_src>
import jax
import jax.numpy as jnp
from jax import lax
from jax.experimental import pallas as pl
from jax.experimental.pallas import tpu as pltpu


def _round_up(v, m):
    return ((v + m - 1) // m) * m


def _cdiv(a, b):
    return -(-a // b)


# ---------------------------------------------------------------------------
# Pallas kernel: node post-MP MLP + per-core one-hot pooling partial sums
# ---------------------------------------------------------------------------
def _hybrid_head_kernel(bidx_ref, x_ref,
                        w1n_ref, b1n_ref, w2n_ref, b2n_ref,
                        node_out_ref, pooled_ref, xpad_ref):
    t = pl.program_id(1)                    # tile index within this core's range
    d = x_ref.shape[1]                      # real (unpadded) feature width

    @pl.when(t == 0)
    def _():
        # Zero the lane-padding staging buffer once per core-block (pad lanes
        # are never written afterwards) and the per-core pooled accumulator,
        # which is an output block resident across the 'arbitrary' tile axis.
        xpad_ref[...] = jnp.zeros_like(xpad_ref)
        pooled_ref[...] = jnp.zeros_like(pooled_ref)

    # Stage the (TN, D) tile into the 128-lane-aligned buffer (VMEM-only copy;
    # HBM traffic stays at the real width D).
    xpad_ref[:, :d] = x_ref[...]
    x = xpad_ref[...]                                            # (TN, Dpad) bf16

    # ---- node post-MP MLP: ReLU(x W1 + b1) W2 + b2 (f32 accumulation) ----
    h = jnp.dot(x, w1n_ref[...], preferred_element_type=jnp.float32) + b1n_ref[...]
    h = jnp.maximum(h, 0.0).astype(x.dtype)
    node_pred = jnp.dot(h, w2n_ref[...], preferred_element_type=jnp.float32) + b2n_ref[...]
    node_out_ref[...] = node_pred.astype(node_out_ref.dtype)     # (TN, Cn) bf16

    # ---- pooling partial sums: exact {0,1} one-hot built on-chip ----
    gp = pooled_ref.shape[0]
    tn = x.shape[0]
    gid = lax.broadcasted_iota(jnp.int32, (gp, tn), 0)           # (Gp, TN)
    onehot = jnp.where(gid == bidx_ref[...], 1.0, 0.0).astype(x.dtype)
    pooled_ref[...] += jnp.dot(onehot, x, preferred_element_type=jnp.float32)


def _hybrid_head_pallas_call(bidx_p, xp, w1n, b1n, w2n, b2n, *, num_cores,
                             tiles_per_core, block_n, gp, dpad, hp, cn,
                             compute_dtype):
    np_, d = xp.shape
    tpc = tiles_per_core

    in_specs = [
        pl.BlockSpec((1, block_n), lambda c, t: (0, c * tpc + t)),   # batch ids (int32)
        pl.BlockSpec((block_n, d), lambda c, t: (c * tpc + t, 0)),   # x tile, real width D
        pl.BlockSpec((dpad, hp), lambda c, t: (0, 0)),               # w1n (resident)
        pl.BlockSpec((1, hp), lambda c, t: (0, 0)),                  # b1n
        pl.BlockSpec((hp, cn), lambda c, t: (0, 0)),                 # w2n
        pl.BlockSpec((1, cn), lambda c, t: (0, 0)),                  # b2n
    ]
    out_specs = [
        pl.BlockSpec((block_n, cn), lambda c, t: (c * tpc + t, 0)),  # node predictions
        pl.BlockSpec((None, gp, dpad), lambda c, t: (c, 0, 0)),      # per-core pooled partials
    ]
    out_shape = [
        jax.ShapeDtypeStruct((np_, cn), compute_dtype),
        jax.ShapeDtypeStruct((num_cores, gp, dpad), jnp.float32),
    ]

    flops = 2 * np_ * dpad * hp + 2 * np_ * hp * cn + 2 * gp * np_ * dpad
    bytes_accessed = (np_ * d * 2 + np_ * 4 + np_ * cn * 2
                      + (dpad * hp + hp * cn) * 2 + (hp + cn) * 4
                      + num_cores * gp * dpad * 4)
    cost = pl.CostEstimate(flops=flops, transcendentals=0,
                           bytes_accessed=bytes_accessed)

    return pl.pallas_call(
        _hybrid_head_kernel,
        grid=(num_cores, tiles_per_core),
        in_specs=in_specs,
        out_specs=out_specs,
        out_shape=out_shape,
        scratch_shapes=[pltpu.VMEM((block_n, dpad), compute_dtype)],  # lane-pad staging
        compiler_params=pltpu.CompilerParams(
            # Leading core axis is parallel (2 TCs on v7x); tile axis carries
            # the pooled accumulator -> arbitrary.
            dimension_semantics=("parallel", "arbitrary"),
            vmem_limit_bytes=32 * 1024 * 1024,   # kernel uses <1 MiB; safe everywhere
        ),
        cost_estimate=cost,
    )(bidx_p, xp, w1n, b1n, w2n, b2n)


# ---------------------------------------------------------------------------
# Glue: _pad_and_stack (plain JAX, matches torch semantics)
# ---------------------------------------------------------------------------
def _pad_and_stack(x1, x2, pad1, pad2):
    padded_x1 = jnp.pad(x1, ((0, 0), (0, pad2)))     # F.pad(x1, (0, pad2))
    padded_x2 = jnp.pad(x2, ((0, 0), (pad1, 0)))     # F.pad(x2, (pad1, 0))
    return jnp.concatenate([padded_x1, padded_x2], axis=0)   # torch.vstack


def gnn_inductive_hybrid_head_forward(x, batch_idx, y, y_graph, params,
                                      num_graphs, node_target_dim,
                                      graph_target_dim, virtual_node=False,
                                      graph_pooling="mean", block_n=512,
                                      num_cores=2, compute_dtype=jnp.bfloat16):
    N, D = x.shape
    G = num_graphs
    w1n, b1n, w2n, b2n, w1g, b1g, w2g, b2g = params
    H = w1n.shape[1]
    Cn = w2n.shape[1]

    Dpad = _round_up(D, 128)     # lane width of the in-VMEM staging buffer only
    Hp = _round_up(H, 128)
    Gp = _round_up(G, 8)

    # Adaptive tile so tiny inputs are not grossly over-padded.
    block_n = max(128, _round_up(min(block_n, _cdiv(N, num_cores)), 128))
    tiles_per_core = _cdiv(N, num_cores * block_n)
    Np = num_cores * tiles_per_core * block_n

    # x keeps its real feature width D; rows padded + bf16 cast in one pass.
    xp = jnp.pad(x, ((0, Np - N), (0, 0))).astype(compute_dtype)
    # Padded node rows get batch id Gp (never matches any pooled row).
    bidx_p = jnp.full((1, Np), Gp, jnp.int32).at[0, :N].set(batch_idx.astype(jnp.int32))

    def pad_w(w, r, c):
        return jnp.zeros((r, c), jnp.float32).at[:w.shape[0], :w.shape[1]].set(w)

    w1n_p = pad_w(w1n, Dpad, Hp).astype(compute_dtype)
    b1n_p = pad_w(b1n, 1, Hp)                   # f32
    w2n_p = pad_w(w2n, Hp, Cn).astype(compute_dtype)
    b2n_p = b2n.astype(jnp.float32)             # (1, Cn), unpadded

    node_pred_p, pooled_partial = _hybrid_head_pallas_call(
        bidx_p, xp, w1n_p, b1n_p, w2n_p, b2n_p,
        num_cores=num_cores, tiles_per_core=tiles_per_core, block_n=block_n,
        gp=Gp, dpad=Dpad, hp=Hp, cn=Cn, compute_dtype=compute_dtype)

    node_pred = node_pred_p[:N].astype(jnp.float32)

    # ---- finalize pooling in f32: per-core reduction + mean scaling ----
    pooled_sum = pooled_partial.sum(axis=0)[:G, :D]              # (G, D) f32
    if graph_pooling == "mean":
        counts = jnp.zeros((G,), jnp.float32).at[batch_idx].add(1.0)
        pooled = pooled_sum / jnp.maximum(counts, 1.0)[:, None]
    else:  # 'add'
        pooled = pooled_sum

    # Tiny (G x D) graph post-MP MLP in plain JAX f32 (negligible vs node stream).
    hg = jnp.maximum(pooled @ w1g + b1g, 0.0)
    graph_pred = hg @ w2g + b2g

    # TODO(synk): virtual_node=True drops the last node of each graph before
    # stacking (data-dependent gather); not lowered (config uses False).
    pred = _pad_and_stack(node_pred, graph_pred, node_target_dim, graph_target_dim)
    true = _pad_and_stack(y, y_graph, node_target_dim, graph_target_dim)
    return pred, true


# ---------------------------------------------------------------------------
# Pure-JAX f32 reference (for sanity check)
# ---------------------------------------------------------------------------
def reference_forward(x, batch_idx, y, y_graph, params, num_graphs,
                      node_target_dim, graph_target_dim, graph_pooling="mean"):
    w1n, b1n, w2n, b2n, w1g, b1g, w2g, b2g = params
    h = jnp.maximum(x @ w1n + b1n, 0.0)
    node_pred = h @ w2n + b2n
    onehot = (batch_idx[None, :] == jnp.arange(num_graphs)[:, None]).astype(jnp.float32)
    counts = onehot.sum(axis=1, keepdims=True)
    pooled = onehot @ x
    if graph_pooling == "mean":
        pooled = pooled / jnp.maximum(counts, 1.0)
    hg = jnp.maximum(pooled @ w1g + b1g, 0.0)
    graph_pred = hg @ w2g + b2g
    pred = _pad_and_stack(node_pred, graph_pred, node_target_dim, graph_target_dim)
    true = _pad_and_stack(y, y_graph, node_target_dim, graph_target_dim)
    return pred, true


# ---------------------------------------------------------------------------
# Deterministic parameter init (PyTorch Linear weights, stored as [in, out])
# ---------------------------------------------------------------------------
def init_params(key, dim_in, node_dim, graph_dim):
    ks = jax.random.split(key, 8)
    s = 0.1
    w1n = s * jax.random.normal(ks[0], (dim_in, dim_in), jnp.float32)
    b1n = s * jax.random.normal(ks[1], (1, dim_in), jnp.float32)
    w2n = s * jax.random.normal(ks[2], (dim_in, node_dim), jnp.float32)
    b2n = s * jax.random.normal(ks[3], (1, node_dim), jnp.float32)
    w1g = s * jax.random.normal(ks[4], (dim_in, dim_in), jnp.float32)
    b1g = s * jax.random.normal(ks[5], (1, dim_in), jnp.float32)
    w2g = s * jax.random.normal(ks[6], (dim_in, graph_dim), jnp.float32)
    b2g = s * jax.random.normal(ks[7], (1, graph_dim), jnp.float32)
    return (w1n, b1n, w2n, b2n, w1g, b1g, w2g, b2g)


if __name__ == "__main__":
    # cfg.share.num_node_targets=8, num_graph_targets=4, gnn.layers_post_mp=2,
    # graph_pooling='mean', virtual_node=False.
    dim_in = 32          # node feature dim
    node_dim = 8         # cfg.share.num_node_targets
    graph_dim = 4        # cfg.share.num_graph_targets
    G = 4                # number of graphs
    sizes = [700, 500, 450, 350]
    N = sum(sizes)       # 2000 nodes -> grid (2 cores, 2 tiles) at block_n=512

    key = jax.random.PRNGKey(0)
    kx, ky, kyg, kp = jax.random.split(key, 4)

    x = jax.random.normal(kx, (N, dim_in), jnp.float32)
    # contiguous per-graph node blocks (as produced by PyG batching)
    batch_idx = jnp.concatenate(
        [jnp.full((s,), g, jnp.int32) for g, s in enumerate(sizes)])
    y = jax.random.normal(ky, (N, node_dim), jnp.float32)          # batch.y
    y_graph = jax.random.normal(kyg, (G, graph_dim), jnp.float32)  # batch.y_graph

    params = init_params(kp, dim_in, node_dim, graph_dim)

    pred, true = gnn_inductive_hybrid_head_forward(
        x, batch_idx, y, y_graph, params,
        num_graphs=G, node_target_dim=node_dim, graph_target_dim=graph_dim,
        virtual_node=False, graph_pooling="mean", block_n=512, num_cores=2,
        compute_dtype=jnp.bfloat16)

    pred = jax.block_until_ready(pred)
    true = jax.block_until_ready(true)

    assert pred.shape == (N + G, node_dim + graph_dim)
    assert true.shape == (N + G, node_dim + graph_dim)

    # Sanity-check vs. pure-JAX f32 reference (bf16 matmul error << 0.03).
    pred_ref, true_ref = reference_forward(
        x, batch_idx, y, y_graph, params, G, node_dim, graph_dim, "mean")
    assert float(jnp.max(jnp.abs(pred - pred_ref))) < 3e-2
    assert float(jnp.max(jnp.abs(true - true_ref))) == 0.0

    print("KERNEL_OK")
</pallas_src>

<mosaic_0001>
module attributes {stable_mosaic.version = 11 : i64} {
  func.func @_hybrid_head_kernel(%arg0: i32, %arg1: i32, %arg2: memref<1x512xi32, #tpu.memory_space<vmem>>, %arg3: memref<512x32xbf16, #tpu.memory_space<vmem>>, %arg4: memref<128x128xbf16, #tpu.memory_space<vmem>>, %arg5: memref<1x128xf32, #tpu.memory_space<vmem>>, %arg6: memref<128x8xbf16, #tpu.memory_space<vmem>>, %arg7: memref<1x8xf32, #tpu.memory_space<vmem>>, %arg8: memref<512x8xbf16, #tpu.memory_space<vmem>>, %arg9: memref<1x8x128xf32, #tpu.memory_space<vmem>>, %arg10: memref<512x128xbf16, #tpu.memory_space<vmem>>) attributes {dimension_semantics = [#tpu.dimension_semantics<parallel>, #tpu.dimension_semantics<arbitrary>], iteration_bounds = array<i64: 2, 2>, scalar_prefetch = 0 : i64, scratch_operands = 1 : i64, tpu.core_type = #tpu.core_type<tc>, window_params = [{transform_indices = @transform_0, window_bounds = array<i64: 1, 512>}, {transform_indices = @transform_1, window_bounds = array<i64: 512, 32>}, {pipeline_mode = #tpu.pipeline_mode<synchronous>, transform_indices = @transform_2, window_bounds = array<i64: 128, 128>}, {pipeline_mode = #tpu.pipeline_mode<synchronous>, transform_indices = @transform_3, window_bounds = array<i64: 1, 128>}, {pipeline_mode = #tpu.pipeline_mode<synchronous>, transform_indices = @transform_4, window_bounds = array<i64: 128, 8>}, {pipeline_mode = #tpu.pipeline_mode<synchronous>, transform_indices = @transform_5, window_bounds = array<i64: 1, 8>}, {transform_indices = @transform_6, window_bounds = array<i64: 512, 8>}, {transform_indices = @transform_7, window_bounds = array<i64: 1, 8, 128>}]} {
    %c0_i32 = arith.constant 0 : i32
    %0 = arith.cmpi eq, %arg1, %c0_i32 : i32
    %1 = arith.extui %0 : i1 to i32
    %c0_i32_0 = arith.constant 0 : i32
    %2 = arith.cmpi ne, %1, %c0_i32_0 : i32
    scf.if %2 {
      %cst_29 = arith.constant 0.000000e+00 : bf16
      %36 = vector.broadcast %cst_29 : bf16 to vector<512x128xbf16>
      %c0_30 = arith.constant 0 : index
      %c0_31 = arith.constant 0 : index
      %37 = vector.load %arg10[%c0_30, %c0_31] : memref<512x128xbf16, #tpu.memory_space<vmem>>, vector<512x128xbf16>
      tpu.vector_store %arg10[%c0_30, %c0_31], %36 {strides = array<i32>} : memref<512x128xbf16, #tpu.memory_space<vmem>>, vector<512x128xbf16>,
      %cst_32 = arith.constant 0.000000e+00 : f32
      %38 = vector.broadcast %cst_32 : f32 to vector<8x128xf32>
      %c0_33 = arith.constant 0 : index
      %c0_34 = arith.constant 0 : index
      %c0_35 = arith.constant 0 : index
      %39 = vector.load %arg9[%c0_33, %c0_34, %c0_35] : memref<1x8x128xf32, #tpu.memory_space<vmem>>, vector<1x8x128xf32>
      %40 = vector.shape_cast %39 : vector<1x8x128xf32> to vector<8x128xf32>
      %41 = vector.shape_cast %38 : vector<8x128xf32> to vector<1x8x128xf32>
      tpu.vector_store %arg9[%c0_33, %c0_34, %c0_35], %41 {strides = array<i32>} : memref<1x8x128xf32, #tpu.memory_space<vmem>>, vector<1x8x128xf32>,
    } else {
    }
    %c0 = arith.constant 0 : index
    %c0_1 = arith.constant 0 : index
    %3 = vector.load %arg3[%c0, %c0_1] : memref<512x32xbf16, #tpu.memory_space<vmem>>, vector<512x32xbf16>
    %c0_2 = arith.constant 0 : index
    %c0_3 = arith.constant 0 : index
    %4 = vector.load %arg10[%c0_2, %c0_3] : memref<512x128xbf16, #tpu.memory_space<vmem>>, vector<512x32xbf16>
    tpu.vector_store %arg10[%c0_2, %c0_3], %3 {strides = array<i32>} : memref<512x128xbf16, #tpu.memory_space<vmem>>, vector<512x32xbf16>,
    %c0_4 = arith.constant 0 : index
    %c0_5 = arith.constant 0 : index
    %5 = vector.load %arg10[%c0_4, %c0_5] : memref<512x128xbf16, #tpu.memory_space<vmem>>, vector<512x128xbf16>
    %c0_6 = arith.constant 0 : index
    %c0_7 = arith.constant 0 : index
    %6 = vector.load %arg4[%c0_6, %c0_7] : memref<128x128xbf16, #tpu.memory_space<vmem>>, vector<128x128xbf16>
    %cst = arith.constant dense<0.000000e+00> : vector<512x128xf32>
    %7 = tpu.matmul %5, %6, %cst {dimension_numbers = #tpu.dot_dimension_numbers<[1], [0], [0], [1], [0, 0, 1, 1], [], []>} : vector<512x128xbf16>, vector<128x128xbf16>, vector<512x128xf32> -> vector<512x128xf32>
    %c0_8 = arith.constant 0 : index
    %c0_9 = arith.constant 0 : index
    %8 = vector.load %arg5[%c0_8, %c0_9] : memref<1x128xf32, #tpu.memory_space<vmem>>, vector<1x128xf32>
    %9 = vector.broadcast %8 : vector<1x128xf32> to vector<512x128xf32>
    %10 = arith.addf %7, %9 : vector<512x128xf32>
    %cst_10 = arith.constant 0.000000e+00 : f32
    %11 = vector.broadcast %cst_10 : f32 to vector<512x128xf32>
    %12 = arith.maximumf %10, %11 : vector<512x128xf32>
    %13 = arith.truncf %12 : vector<512x128xf32> to vector<512x128xbf16>
    %c0_11 = arith.constant 0 : index
    %c0_12 = arith.constant 0 : index
    %14 = vector.load %arg6[%c0_11, %c0_12] : memref<128x8xbf16, #tpu.memory_space<vmem>>, vector<128x8xbf16>
    %cst_13 = arith.constant dense<0.000000e+00> : vector<512x8xf32>
    %15 = tpu.matmul %13, %14, %cst_13 {dimension_numbers = #tpu.dot_dimension_numbers<[1], [0], [0], [1], [0, 0, 1, 1], [], []>} : vector<512x128xbf16>, vector<128x8xbf16>, vector<512x8xf32> -> vector<512x8xf32>
    %c0_14 = arith.constant 0 : index
    %c0_15 = arith.constant 0 : index
    %16 = vector.load %arg7[%c0_14, %c0_15] : memref<1x8xf32, #tpu.memory_space<vmem>>, vector<1x8xf32>
    %17 = vector.broadcast %16 : vector<1x8xf32> to vector<512x8xf32>
    %18 = arith.addf %15, %17 : vector<512x8xf32>
    %19 = arith.truncf %18 : vector<512x8xf32> to vector<512x8xbf16>
    %c0_16 = arith.constant 0 : index
    %c0_17 = arith.constant 0 : index
    %20 = vector.load %arg8[%c0_16, %c0_17] : memref<512x8xbf16, #tpu.memory_space<vmem>>, vector<512x8xbf16>
    tpu.vector_store %arg8[%c0_16, %c0_17], %19 {strides = array<i32>} : memref<512x8xbf16, #tpu.memory_space<vmem>>, vector<512x8xbf16>,
    %21 = tpu.iota {dimensions = array<i32: 0>} : vector<8x512xi32>
    %c0_18 = arith.constant 0 : index
    %c0_19 = arith.constant 0 : index
    %22 = vector.load %arg2[%c0_18, %c0_19] : memref<1x512xi32, #tpu.memory_space<vmem>>, vector<1x512xi32>
    %23 = vector.broadcast %22 : vector<1x512xi32> to vector<8x512xi32>
    %24 = arith.cmpi eq, %21, %23 : vector<8x512xi32>
    %cst_20 = arith.constant 1.000000e+00 : f32
    %cst_21 = arith.constant 0.000000e+00 : f32
    %25 = vector.broadcast %cst_20 : f32 to vector<8x512xf32>
    %26 = vector.broadcast %cst_21 : f32 to vector<8x512xf32>
    %27 = arith.select %24, %25, %26 : vector<8x512xi1>, vector<8x512xf32>
    %28 = arith.truncf %27 : vector<8x512xf32> to vector<8x512xbf16>
    %c0_22 = arith.constant 0 : index
    %c0_23 = arith.constant 0 : index
    %c0_24 = arith.constant 0 : index
    %29 = vector.load %arg9[%c0_22, %c0_23, %c0_24] : memref<1x8x128xf32, #tpu.memory_space<vmem>>, vector<1x8x128xf32>
    %30 = vector.shape_cast %29 : vector<1x8x128xf32> to vector<8x128xf32>
    %cst_25 = arith.constant dense<0.000000e+00> : vector<8x128xf32>
    %31 = tpu.matmul %28, %5, %cst_25 {dimension_numbers = #tpu.dot_dimension_numbers<[1], [0], [0], [1], [0, 0, 1, 1], [], []>} : vector<8x512xbf16>, vector<512x128xbf16>, vector<8x128xf32> -> vector<8x128xf32>
    %32 = arith.addf %30, %31 : vector<8x128xf32>
    %c0_26 = arith.constant 0 : index
    %c0_27 = arith.constant 0 : index
    %c0_28 = arith.constant 0 : index
    %33 = vector.load %arg9[%c0_26, %c0_27, %c0_28] : memref<1x8x128xf32, #tpu.memory_space<vmem>>, vector<1x8x128xf32>
    %34 = vector.shape_cast %33 : vector<1x8x128xf32> to vector<8x128xf32>
    %35 = vector.shape_cast %32 : vector<8x128xf32> to vector<1x8x128xf32>
    tpu.vector_store %arg9[%c0_26, %c0_27, %c0_28], %35 {strides = array<i32>} : memref<1x8x128xf32, #tpu.memory_space<vmem>>, vector<1x8x128xf32>,
    return
  }
  func.func @transform_0(%arg0: i32, %arg1: i32) -> (i32, i32) {
    %c2_i32 = arith.constant 2 : i32
    %0 = arith.muli %arg0, %c2_i32 : i32
    %1 = arith.addi %0, %arg1 : i32
    %c0_i32 = arith.constant 0 : i32
    %c0_i32_0 = arith.constant 0 : i32
    return %c0_i32, %1 : i32, i32
  }
  func.func @transform_1(%arg0: i32, %arg1: i32) -> (i32, i32) {
    %c2_i32 = arith.constant 2 : i32
    %0 = arith.muli %arg0, %c2_i32 : i32
    %1 = arith.addi %0, %arg1 : i32
    %c0_i32 = arith.constant 0 : i32
    %c0_i32_0 = arith.constant 0 : i32
    return %1, %c0_i32 : i32, i32
  }
  func.func @transform_2(%arg0: i32, %arg1: i32) -> (i32, i32) {
    %c0_i32 = arith.constant 0 : i32
    %c0_i32_0 = arith.constant 0 : i32
    %c0_i32_1 = arith.constant 0 : i32
    return %c0_i32, %c0_i32_0 : i32, i32
  }
  func.func @transform_3(%arg0: i32, %arg1: i32) -> (i32, i32) {
    %c0_i32 = arith.constant 0 : i32
    %c0_i32_0 = arith.constant 0 : i32
    %c0_i32_1 = arith.constant 0 : i32
    return %c0_i32, %c0_i32_0 : i32, i32
  }
  func.func @transform_4(%arg0: i32, %arg1: i32) -> (i32, i32) {
    %c0_i32 = arith.constant 0 : i32
    %c0_i32_0 = arith.constant 0 : i32
    %c0_i32_1 = arith.constant 0 : i32
    return %c0_i32, %c0_i32_0 : i32, i32
  }
  func.func @transform_5(%arg0: i32, %arg1: i32) -> (i32, i32) {
    %c0_i32 = arith.constant 0 : i32
    %c0_i32_0 = arith.constant 0 : i32
    %c0_i32_1 = arith.constant 0 : i32
    return %c0_i32, %c0_i32_0 : i32, i32
  }
  func.func @transform_6(%arg0: i32, %arg1: i32) -> (i32, i32) {
    %c2_i32 = arith.constant 2 : i32
    %0 = arith.muli %arg0, %c2_i32 : i32
    %1 = arith.addi %0, %arg1 : i32
    %c0_i32 = arith.constant 0 : i32
    %c0_i32_0 = arith.constant 0 : i32
    return %1, %c0_i32 : i32, i32
  }
  func.func @transform_7(%arg0: i32, %arg1: i32) -> (i32, i32, i32) {
    %c0_i32 = arith.constant 0 : i32
    %c0_i32_0 = arith.constant 0 : i32
    %c0_i32_1 = arith.constant 0 : i32
    return %arg0, %c0_i32, %c0_i32_0 : i32, i32, i32
  }
}

</mosaic_0001>

<bundles_post_ra>
// kernel: tpu_custom_call.1
= control target key start
LH: loop header
LB: loop body
LE: loop exit
PB: predicated region body
PF: predicated region fallthrough
CT: control target
= control target key end

     0   :  { %13 = vsyncpa [#allocation4], 0  ;;  %s3721_s0 = inlined_call_operand.vmem [shape: s32[1,2048], index: 0, kind: input, shape index: {}]   ;;  %s3722_s1 = inlined_call_operand.vmem [shape: bf16[2048,32], index: 1, kind: input, shape index: {}]   ;;  %s3723_s2 = inlined_call_operand.vmem [shape: bf16[128,128], index: 2, kind: input, shape index: {}]   ;;  %s3724_s3 = inlined_call_operand.vmem [shape: f32[1,128], index: 3, kind: input, shape index: {}]   ;;  %s3725_s4 = inlined_call_operand.vmem [shape: bf16[128,8], index: 4, kind: input, shape index: {}]   ;;  %s3726_s5 = inlined_call_operand.vmem [shape: f32[1,8], index: 5, kind: input, shape index: {}]   ;;  %s3727_s6 = inlined_call_operand.vmem [shape: bf16[2048,8], index: 6, kind: output, shape index: {0}]   ;;  %s3728_s7 = inlined_call_operand.hbm [shape: f32[2,8,128], index: 7, kind: output, shape index: {1}]  }
   0x1   :  { %15 = vsyncpa [#allocation4 + $0x1], 0  ;;  %s2956_s24 = smov 0   ;;  %s2958_s25 = smov 0  }
   0x2   :  { %s2960_s26 = smov 0   ;;  %s2962_s27 = smov 0  }
   0x3   :  { %s2964_s28 = smov 0   ;;  %s2966_s29 = smov 0  }
   0x4   :  { %s2968_s30 = smov 0   ;;  %s2970_s8 = smov 0  }
   0x5 LB: > { %3733 = sst [smem:[#allocation6_spill]] %s2902_s29  ;;  %s2201_s9 = sadd.s32 4294967295, %s2910_s8   ;;  %s2910_s8 = sphi %s2970_s8, %s21_s8   ;;  %s2906_s30 = sphi %s2968_s30, %s3743_s30   ;;  %s2902_s29 = sphi %s2966_s29, %s3742_s29   ;;  %s2898_s28 = sphi %s2964_s28, %s3741_s28   ;;  %s2894_s27 = sphi %s2962_s27, %s3740_s27   ;;  %s2890_s26 = sphi %s2960_s26, %s3746_s26   ;;  %s2886_s25 = sphi %s2958_s25, %s3745_s25   ;;  %s2882_s24 = sphi %s2956_s24, %s3744_s24  }
   0x6   : > { %3734 = sst [smem:[#allocation7_spill]] %s2906_s30  ;;  %s2202_s10 = sadd.s32 4294967294, %s2910_s8  }
   0x7   : > { %s30_s11 = sadd.s32 1, %s2902_s29  ;;  %s33_s12 = sadd.s32 1, %s2906_s30 }
   0x8   : > { %p31_p0 = scmp.ge.s32.totalorder %s30_s11, 2  ;;  %p224_p1 = scmp.ne.s32.totalorder %s2890_s26, %s2886_s25 }
   0x9   : > { %p225_p2 = scmp.eq.s32.totalorder %s2201_s9, 3  ;;  %p230_p4 = scmp.ne.s32.totalorder %s2886_s25, %s2882_s24 }
   0xa   : > { %s3748_s11 = smov (%p31_p0, %s30_s11), 0  ;;  %s3750_s12 = smov (!%p31_p0, %s33_s12), %s2906_s30 }
   0xb   : > { %3735 = sst [smem:[#allocation8_spill]] %s3748_s11  ;;  %p3005_p3 = por %p225_p2, %p224_p1 }
   0xc   : > { %p35_p5 = scmp.ge.s32.totalorder %s3750_s12, 2  ;;  %p231_p6 = scmp.eq.s32.totalorder %s2202_s10, 3 }
   0xd   : > { %p2211_p7 = scmp.ge.s32.totalorder %s2910_s8, 1  ;;  %p286_p8 = scmp.lt.s32.totalorder %s2910_s8, 5 }
   0xe   : > { %s3752_s12 = smov (%p35_p5, %s3750_s12), 0  ;;  %p3015_p9 = por %p231_p6, %p230_p4 }
   0xf   : > { %3737 = sst [smem:[#allocation9_spill]] %s3752_s12  ;;  %p287_p10 = pnand %p2211_p7, %p286_p8 }
  0x10   : > { %s211_s15 = ssub.s32 %s2906_s30, %s3752_s12  ;;  %s214_s16 = sadd.s32 1, %s2890_s26 }
  0x11   : > { %p212_p11 = scmp.eq.s32.totalorder %s211_s15, 0  ;;  %290 = sbr.rel (%p287_p10) target bundleno = 649 (0x289), region = 44 }
  0x12   : > { %s3731_s18 = sand.u32 (!%p287_p10), 1, %s2886_s25   ;;  %s2213_s19 = sshll.u32 (!%p287_p10), %s2898_s28, 1 }
  0x13   : > { %s3023_s17 = scalar_select %p212_p11, %s2890_s26, %s214_s16  }
  0x14   : > { %s2212_s20 = sshll.u32 (!%p287_p10), %s3731_s18, 3  ;;  %s334_s21 = sadd.s32 (!%p287_p10), %s2894_s27, %s2213_s19 }
  0x15   : > { %s2214_s22 = sshll.u32 (!%p287_p10), %s334_s21, 2  ;;  %s2216_s23 = sshll.u32 (!%p287_p10), %s334_s21, 6 }
  0x16   : > { %p336_p12 = scmp.lt.s32.totalorder %s2214_s22, 15  ;;  %p345_p13 = scmp.lt.s32.totalorder %s2216_s23, 255 }
  0x17   : > { %s3046_s21 = scalar_lea.vmem [#allocation3], %s2212_s20  ;;  %p2221_p0 = scmp.ne.s32.totalorder %s2894_s27, 0 }
  0x18   : > { %s3754_s22 = smov (!%p336_p12, %s2214_s22), 15  ;;  %s3756_s23 = smov (!%p345_p13, %s2216_s23), 255 }
  0x19   : > { %s338_s15 = scalar_lea.vmem %s3721_s0, %s3754_s22  ;;  %s2217_s16 = sshll.u32 %s3756_s23, 2 }
  0x1a   : > { %s3039_s30 = scalar_lea.vmem %s3722_s1, %s2217_s16  ;;  %s3044_s29 = scalar_lea.vmem %s3727_s6, %s2217_s16 }
  0x1b   : > { %366 = sbr.rel (%p2221_p0) target bundleno = 66 (0x42), region = 48 }
  0x20   : > { %v2912_v0 = vmov 0   ;;  %v2913_v1 = vmov 0.0  }
  0x21   : > { %367 = vst [vmem:[#allocation2] sm:$0xf] %v2912_v0  ;;  %368 = vst [vmem:[#allocation2 + $0x4] sm:$0xf] %v2912_v0 }
  0x22   : > { %369 = vst [vmem:[#allocation2 + $0x8] sm:$0xf] %v2912_v0  ;;  %370 = vst [vmem:[#allocation2 + $0xc] sm:$0xf] %v2912_v0 }
  0x23   : > { %371 = vst [vmem:[#allocation2 + $0x10] sm:$0xf] %v2912_v0  ;;  %372 = vst [vmem:[#allocation2 + $0x14] sm:$0xf] %v2912_v0 }
  0x24   : > { %373 = vst [vmem:[#allocation2 + $0x18] sm:$0xf] %v2912_v0  ;;  %374 = vst [vmem:[#allocation2 + $0x1c] sm:$0xf] %v2912_v0 }
  0x25   : > { %375 = vst [vmem:[#allocation2 + $0x20] sm:$0xf] %v2912_v0  ;;  %376 = vst [vmem:[#allocation2 + $0x24] sm:$0xf] %v2912_v0 }
  0x26   : > { %377 = vst [vmem:[#allocation2 + $0x28] sm:$0xf] %v2912_v0  ;;  %378 = vst [vmem:[#allocation2 + $0x2c] sm:$0xf] %v2912_v0 }
  0x27   : > { %379 = vst [vmem:[#allocation2 + $0x30] sm:$0xf] %v2912_v0  ;;  %380 = vst [vmem:[#allocation2 + $0x34] sm:$0xf] %v2912_v0 }
  0x28   : > { %381 = vst [vmem:[#allocation2 + $0x38] sm:$0xf] %v2912_v0  ;;  %382 = vst [vmem:[#allocation2 + $0x3c] sm:$0xf] %v2912_v0 }
  0x29   : > { %383 = vst [vmem:[#allocation2 + $0x40] sm:$0xf] %v2912_v0  ;;  %384 = vst [vmem:[#allocation2 + $0x44] sm:$0xf] %v2912_v0 }
  0x2a   : > { %385 = vst [vmem:[#allocation2 + $0x48] sm:$0xf] %v2912_v0  ;;  %386 = vst [vmem:[#allocation2 + $0x4c] sm:$0xf] %v2912_v0 }
  0x2b   : > { %387 = vst [vmem:[#allocation2 + $0x50] sm:$0xf] %v2912_v0  ;;  %388 = vst [vmem:[#allocation2 + $0x54] sm:$0xf] %v2912_v0 }
  0x2c   : > { %389 = vst [vmem:[#allocation2 + $0x58] sm:$0xf] %v2912_v0  ;;  %390 = vst [vmem:[#allocation2 + $0x5c] sm:$0xf] %v2912_v0 }
  0x2d   : > { %391 = vst [vmem:[#allocation2 + $0x60] sm:$0xf] %v2912_v0  ;;  %392 = vst [vmem:[#allocation2 + $0x64] sm:$0xf] %v2912_v0 }
  0x2e   : > { %393 = vst [vmem:[#allocation2 + $0x68] sm:$0xf] %v2912_v0  ;;  %394 = vst [vmem:[#allocation2 + $0x6c] sm:$0xf] %v2912_v0 }
  0x2f   : > { %395 = vst [vmem:[#allocation2 + $0x70] sm:$0xf] %v2912_v0  ;;  %396 = vst [vmem:[#allocation2 + $0x74] sm:$0xf] %v2912_v0 }
  0x30   : > { %397 = vst [vmem:[#allocation2 + $0x78] sm:$0xf] %v2912_v0  ;;  %398 = vst [vmem:[#allocation2 + $0x7c] sm:$0xf] %v2912_v0 }
  0x31   : > { %399 = vst [vmem:[#allocation2 + $0x80] sm:$0xf] %v2912_v0  ;;  %400 = vst [vmem:[#allocation2 + $0x84] sm:$0xf] %v2912_v0 }
  0x32   : > { %401 = vst [vmem:[#allocation2 + $0x88] sm:$0xf] %v2912_v0  ;;  %402 = vst [vmem:[#allocation2 + $0x8c] sm:$0xf] %v2912_v0 }
  0x33   : > { %403 = vst [vmem:[#allocation2 + $0x90] sm:$0xf] %v2912_v0  ;;  %404 = vst [vmem:[#allocation2 + $0x94] sm:$0xf] %v2912_v0 }
  0x34   : > { %405 = vst [vmem:[#allocation2 + $0x98] sm:$0xf] %v2912_v0  ;;  %406 = vst [vmem:[#allocation2 + $0x9c] sm:$0xf] %v2912_v0 }
  0x35   : > { %407 = vst [vmem:[#allocation2 + $0xa0] sm:$0xf] %v2912_v0  ;;  %408 = vst [vmem:[#allocation2 + $0xa4] sm:$0xf] %v2912_v0 }
  0x36   : > { %409 = vst [vmem:[#allocation2 + $0xa8] sm:$0xf] %v2912_v0  ;;  %410 = vst [vmem:[#allocation2 + $0xac] sm:$0xf] %v2912_v0 }
  0x37   : > { %411 = vst [vmem:[#allocation2 + $0xb0] sm:$0xf] %v2912_v0  ;;  %412 = vst [vmem:[#allocation2 + $0xb4] sm:$0xf] %v2912_v0 }
  0x38   : > { %413 = vst [vmem:[#allocation2 + $0xb8] sm:$0xf] %v2912_v0  ;;  %414 = vst [vmem:[#allocation2 + $0xbc] sm:$0xf] %v2912_v0 }
  0x39   : > { %415 = vst [vmem:[#allocation2 + $0xc0] sm:$0xf] %v2912_v0  ;;  %416 = vst [vmem:[#allocation2 + $0xc4] sm:$0xf] %v2912_v0 }
  0x3a   : > { %417 = vst [vmem:[#allocation2 + $0xc8] sm:$0xf] %v2912_v0  ;;  %418 = vst [vmem:[#allocation2 + $0xcc] sm:$0xf] %v2912_v0 }
  0x3b   : > { %419 = vst [vmem:[#allocation2 + $0xd0] sm:$0xf] %v2912_v0  ;;  %420 = vst [vmem:[#allocation2 + $0xd4] sm:$0xf] %v2912_v0 }
  0x3c   : > { %421 = vst [vmem:[#allocation2 + $0xd8] sm:$0xf] %v2912_v0  ;;  %422 = vst [vmem:[#allocation2 + $0xdc] sm:$0xf] %v2912_v0 }
  0x3d   : > { %423 = vst [vmem:[#allocation2 + $0xe0] sm:$0xf] %v2912_v0  ;;  %424 = vst [vmem:[#allocation2 + $0xe4] sm:$0xf] %v2912_v0 }
  0x3e   : > { %425 = vst [vmem:[#allocation2 + $0xe8] sm:$0xf] %v2912_v0  ;;  %426 = vst [vmem:[#allocation2 + $0xec] sm:$0xf] %v2912_v0 }
  0x3f   : > { %427 = vst [vmem:[#allocation2 + $0xf0] sm:$0xf] %v2912_v0  ;;  %428 = vst [vmem:[#allocation2 + $0xf4] sm:$0xf] %v2912_v0 }
  0x40   : > { %429 = vst [vmem:[#allocation2 + $0xf8] sm:$0xf] %v2912_v0  ;;  %430 = vst [vmem:[#allocation2 + $0xfc] sm:$0xf] %v2912_v0 }
  0x41   : > { %431 = vst [vmem:[%s3046_s21] sm:$0xff] %v2913_v1 }
  0x42 PF: > { %v2770_v2 = vld [vmem:[%s3723_s2 + $0x38] sm:$0xff]   ;;  %v2771_v3 = vld [vmem:[%s3723_s2 + $0x30] sm:$0xff]   ;;  %v2772_v4 = vld [vmem:[%s3723_s2 + $0x28] sm:$0xff]   ;;  %vm496_vm0 = vcmask 257024   ;;  %vm1889_vm9 = vcmask 60416   ;;  %s2345_s20 = sshll.u32 %s2898_s28, 7 }
  0x43   : > { %2536 = vmatprep.subr.bf16.mxu0 %v2770_v2  ;;  %v2773_v5 = vld [vmem:[%s3723_s2 + $0x20] sm:$0xff]   ;;  %v434_v8 = vld [vmem:[%s3039_s30 + $0x8] sm:$0xf]  ;;  %v435_v9 = vld [vmem:[%s3039_s30 + $0xc] sm:$0xf]  ;;  %s2095_s23 = sshll.u32 %s3046_s21, 4  ;;  %s2093_s16 = scalar_lea.hbm %s3728_s7, %s2345_s20  ;;  %s2096_s23 = int_to_ptr.vmem [resolvable:$true] %s2095_s23 }
  0x44   : > { %2537 = vmatpush3.bf16.msra.mxu0 %v2770_v2  ;;  %v432_v6 = vld [vmem:[%s3039_s30] sm:$0xf]  ;;  %v433_v7 = vld [vmem:[%s3039_s30 + $0x4] sm:$0xf]  ;;  %499 = vst.msk [vmem:[#allocation2 + $0x8] sm:$0xf] %vm496_vm0, %v434_v8 }
  0x45   : > { %2538 = vmatprep.subr.bf16.mxu0 %v2771_v3  ;;  %497 = vst.msk [vmem:[#allocation2] sm:$0xf] %vm496_vm0, %v432_v6  ;;  %498 = vst.msk [vmem:[#allocation2 + $0x4] sm:$0xf] %vm496_vm0, %v433_v7  ;;  %v436_v10 = vld [vmem:[%s3039_s30 + $0x10] sm:$0xf] }
  0x46   : > { %v437_v11 = vld [vmem:[%s3039_s30 + $0x14] sm:$0xf]  ;;  %v2774_v12 = vld [vmem:[%s3723_s2 + $0x18] sm:$0xff]   ;;  %500 = vst.msk [vmem:[#allocation2 + $0xc] sm:$0xf] %vm496_vm0, %v435_v9  ;;  %v2776_v33 = vld [vmem:[%s3723_s2 + $0x8] sm:$0xff]  }
  0x47   : > { %501 = vst.msk [vmem:[#allocation2 + $0x10] sm:$0xf] %vm496_vm0, %v436_v10  ;;  %502 = vst.msk [vmem:[#allocation2 + $0x14] sm:$0xf] %vm496_vm0, %v437_v11  ;;  %v438_v13 = vld [vmem:[%s3039_s30 + $0x18] sm:$0xf] }
  0x48   : > { %2539 = vmatpush3.bf16.msra.mxu0 %v2771_v3  ;;  %v439_v14 = vld [vmem:[%s3039_s30 + $0x1c] sm:$0xf]  ;;  %v440_v15 = vld [vmem:[%s3039_s30 + $0x20] sm:$0xf]  ;;  %503 = vst.msk [vmem:[#allocation2 + $0x18] sm:$0xf] %vm496_vm0, %v438_v13 }
  0x49   : > { %2540 = vmatprep.subr.bf16.mxu0 %v2772_v4  ;;  %504 = vst.msk [vmem:[#allocation2 + $0x1c] sm:$0xf] %vm496_vm0, %v439_v14  ;;  %v441_v16 = vld [vmem:[%s3039_s30 + $0x24] sm:$0xf]  ;;  %505 = vst.msk [vmem:[#allocation2 + $0x20] sm:$0xf] %vm496_vm0, %v440_v15 }
  0x4a   : > { %v442_v17 = vld [vmem:[%s3039_s30 + $0x28] sm:$0xf]  ;;  %v443_v18 = vld [vmem:[%s3039_s30 + $0x2c] sm:$0xf]  ;;  %506 = vst.msk [vmem:[#allocation2 + $0x24] sm:$0xf] %vm496_vm0, %v441_v16 }
  0x4b   : > { %507 = vst.msk [vmem:[#allocation2 + $0x28] sm:$0xf] %vm496_vm0, %v442_v17  ;;  %508 = vst.msk [vmem:[#allocation2 + $0x2c] sm:$0xf] %vm496_vm0, %v443_v18  ;;  %v444_v19 = vld [vmem:[%s3039_s30 + $0x30] sm:$0xf] }
  0x4c   : > { %2541 = vmatpush3.bf16.msra.mxu0 %v2772_v4  ;;  %v445_v20 = vld [vmem:[%s3039_s30 + $0x34] sm:$0xf]  ;;  %v446_v21 = vld [vmem:[%s3039_s30 + $0x38] sm:$0xf]  ;;  %509 = vst.msk [vmem:[#allocation2 + $0x30] sm:$0xf] %vm496_vm0, %v444_v19 }
  0x4d   : > { %2542 = vmatprep.subr.bf16.mxu0 %v2773_v5  ;;  %510 = vst.msk [vmem:[#allocation2 + $0x34] sm:$0xf] %vm496_vm0, %v445_v20  ;;  %v447_v22 = vld [vmem:[%s3039_s30 + $0x3c] sm:$0xf]  ;;  %511 = vst.msk [vmem:[#allocation2 + $0x38] sm:$0xf] %vm496_vm0, %v446_v21 }
  0x4e   : > { %v448_v23 = vld [vmem:[%s3039_s30 + $0x40] sm:$0xf]  ;;  %v449_v24 = vld [vmem:[%s3039_s30 + $0x44] sm:$0xf]  ;;  %v2775_v25 = vld [vmem:[%s3723_s2 + $0x10] sm:$0xff]   ;;  %s3739_s19 = sand.u32 1, %s2886_s25  }
  0x4f   : > { %512 = vst.msk [vmem:[#allocation2 + $0x3c] sm:$0xf] %vm496_vm0, %v447_v22  ;;  %513 = vst.msk [vmem:[#allocation2 + $0x40] sm:$0xf] %vm496_vm0, %v448_v23  ;;  %v450_v26 = vld [vmem:[%s3039_s30 + $0x48] sm:$0xf] }
  0x50   : > { %514 = vst.msk [vmem:[#allocation2 + $0x44] sm:$0xf] %vm496_vm0, %v449_v24  ;;  %v451_v27 = vld [vmem:[%s3039_s30 + $0x4c] sm:$0xf]  ;;  %v452_v28 = vld [vmem:[%s3039_s30 + $0x50] sm:$0xf]  ;;  %2543 = vmatpush3.bf16.msra.mxu0 %v2773_v5 }
  0x51   : > { %515 = vst.msk [vmem:[#allocation2 + $0x48] sm:$0xf] %vm496_vm0, %v450_v26  ;;  %516 = vst.msk [vmem:[#allocation2 + $0x4c] sm:$0xf] %vm496_vm0, %v451_v27  ;;  %v453_v29 = vld [vmem:[%s3039_s30 + $0x54] sm:$0xf]  ;;  %2544 = vmatprep.subr.bf16.mxu0 %v2774_v12 }
  0x52   : > { %517 = vst.msk [vmem:[#allocation2 + $0x50] sm:$0xf] %vm496_vm0, %v452_v28  ;;  %v454_v30 = vld [vmem:[%s3039_s30 + $0x58] sm:$0xf]  ;;  %v455_v31 = vld [vmem:[%s3039_s30 + $0x5c] sm:$0xf] }
  0x53   : > { %v3177_v32 = vld [vmem:[#allocation2] sm:$0xff]   ;;  %518 = vst.msk [vmem:[#allocation2 + $0x54] sm:$0xf] %vm496_vm0, %v453_v29  ;;  %519 = vst.msk [vmem:[#allocation2 + $0x58] sm:$0xf] %vm496_vm0, %v454_v30  ;;  %v3189_v35 = vld [vmem:[#allocation2 + $0x8] sm:$0xff]  }
  0x54   : > { %520 = vst.msk [vmem:[#allocation2 + $0x5c] sm:$0xf] %vm496_vm0, %v455_v31  ;;  %2552 = vmatprep.mubr.bf16.mxu0 %v3177_v32  ;;  %2545 = vmatpush3.bf16.msra.mxu0 %v2774_v12  ;;  %v2777_v34 = vld [vmem:[%s3723_s2] sm:$0xff]   ;;  %v458_v38 = vld [vmem:[%s3039_s30 + $0x68] sm:$0xf]  ;;  %v3194_v39 = vld [vmem:[#allocation2 + $0x10] sm:$0xff]  }
  0x55   : > { %2546 = vmatprep.subr.bf16.mxu0 %v2775_v25  ;;  %v456_v36 = vld [vmem:[%s3039_s30 + $0x60] sm:$0xf]  ;;  %v457_v37 = vld [vmem:[%s3039_s30 + $0x64] sm:$0xf]  ;;  %v459_v40 = vld [vmem:[%s3039_s30 + $0x6c] sm:$0xf] }
  0x56   : > { %521 = vst.msk [vmem:[#allocation2 + $0x60] sm:$0xf] %vm496_vm0, %v456_v36  ;;  %522 = vst.msk [vmem:[#allocation2 + $0x64] sm:$0xf] %vm496_vm0, %v457_v37  ;;  %v460_v41 = vld [vmem:[%s3039_s30 + $0x70] sm:$0xf] }
  0x57   : > { %523 = vst.msk [vmem:[#allocation2 + $0x68] sm:$0xf] %vm496_vm0, %v458_v38  ;;  %v461_v42 = vld [vmem:[%s3039_s30 + $0x74] sm:$0xf]  ;;  %524 = vst.msk [vmem:[#allocation2 + $0x6c] sm:$0xf] %vm496_vm0, %v459_v40 }
  0x58   : > { %2547 = vmatpush3.bf16.msra.mxu0 %v2775_v25  ;;  %525 = vst.msk [vmem:[#allocation2 + $0x70] sm:$0xf] %vm496_vm0, %v460_v41  ;;  %526 = vst.msk [vmem:[#allocation2 + $0x74] sm:$0xf] %vm496_vm0, %v461_v42  ;;  %v462_v43 = vld [vmem:[%s3039_s30 + $0x78] sm:$0xf] }
  0x59   : > { %2548 = vmatprep.subr.bf16.mxu0 %v2776_v33  ;;  %v463_v44 = vld [vmem:[%s3039_s30 + $0x7c] sm:$0xf]  ;;  %v464_v45 = vld [vmem:[%s3039_s30 + $0x80] sm:$0xf]  ;;  %527 = vst.msk [vmem:[#allocation2 + $0x78] sm:$0xf] %vm496_vm0, %v462_v43 }
  0x5a   : > { %528 = vst.msk [vmem:[#allocation2 + $0x7c] sm:$0xf] %vm496_vm0, %v463_v44  ;;  %v465_v46 = vld [vmem:[%s3039_s30 + $0x84] sm:$0xf]  ;;  %529 = vst.msk [vmem:[#allocation2 + $0x80] sm:$0xf] %vm496_vm0, %v464_v45 }
  0x5b   : > { %v466_v47 = vld [vmem:[%s3039_s30 + $0x88] sm:$0xf]  ;;  %v467_v48 = vld [vmem:[%s3039_s30 + $0x8c] sm:$0xf]  ;;  %530 = vst.msk [vmem:[#allocation2 + $0x84] sm:$0xf] %vm496_vm0, %v465_v46 }
  0x5c   : > { %2549 = vmatpush3.bf16.msra.mxu0 %v2776_v33  ;;  %531 = vst.msk [vmem:[#allocation2 + $0x88] sm:$0xf] %vm496_vm0, %v466_v47  ;;  %532 = vst.msk [vmem:[#allocation2 + $0x8c] sm:$0xf] %vm496_vm0, %v467_v48  ;;  %v468_v49 = vld [vmem:[%s3039_s30 + $0x90] sm:$0xf] }
  0x5d   : > { %2550 = vmatprep.subr.bf16.mxu0 %v2777_v34  ;;  %v469_v50 = vld [vmem:[%s3039_s30 + $0x94] sm:$0xf]  ;;  %v470_v51 = vld [vmem:[%s3039_s30 + $0x98] sm:$0xf]  ;;  %533 = vst.msk [vmem:[#allocation2 + $0x90] sm:$0xf] %vm496_vm0, %v468_v49 }
  0x5e   : > { %534 = vst.msk [vmem:[#allocation2 + $0x94] sm:$0xf] %vm496_vm0, %v469_v50  ;;  %v471_v52 = vld [vmem:[%s3039_s30 + $0x9c] sm:$0xf]  ;;  %535 = vst.msk [vmem:[#allocation2 + $0x98] sm:$0xf] %vm496_vm0, %v470_v51  ;;  %v1954_v50 = vlaneseq }
  0x5f   : > { %v472_v53 = vld [vmem:[%s3039_s30 + $0xa0] sm:$0xf]  ;;  %v473_v54 = vld [vmem:[%s3039_s30 + $0xa4] sm:$0xf]  ;;  %536 = vst.msk [vmem:[#allocation2 + $0x9c] sm:$0xf] %vm496_vm0, %v471_v52 }
  0x60   : > { %2551 = vmatpush3.bf16.msra.mxu0 %v2777_v34  ;;  %537 = vst.msk [vmem:[#allocation2 + $0xa0] sm:$0xf] %vm496_vm0, %v472_v53  ;;  %538 = vst.msk [vmem:[#allocation2 + $0xa4] sm:$0xf] %vm496_vm0, %v473_v54  ;;  %v474_v55 = vld [vmem:[%s3039_s30 + $0xa8] sm:$0xf] }
  0x61   : > { %v475_v56 = vld [vmem:[%s3039_s30 + $0xac] sm:$0xf]  ;;  %v476_v57 = vld [vmem:[%s3039_s30 + $0xb0] sm:$0xf]  ;;  %539 = vst.msk [vmem:[#allocation2 + $0xa8] sm:$0xf] %vm496_vm0, %v474_v55 }
  0x62   : > { %540 = vst.msk [vmem:[#allocation2 + $0xac] sm:$0xf] %vm496_vm0, %v475_v56  ;;  %v477_v58 = vld [vmem:[%s3039_s30 + $0xb4] sm:$0xf]  ;;  %541 = vst.msk [vmem:[#allocation2 + $0xb0] sm:$0xf] %vm496_vm0, %v476_v57 }
  0x63   : > { %2553 = vmatmul.mubr.bf16.vlgmr.msra.gmra.mxu0 %v3189_v35  ;;  %v478_v59 = vld [vmem:[%s3039_s30 + $0xb8] sm:$0xf]  ;;  %v479_v60 = vld [vmem:[%s3039_s30 + $0xbc] sm:$0xf]  ;;  %542 = vst.msk [vmem:[#allocation2 + $0xb4] sm:$0xf] %vm496_vm0, %v477_v58 }
  0x64   : > { %2556 = vmatprep.mubr.bf16.mxu0 %v3194_v39  ;;  %543 = vst.msk [vmem:[#allocation2 + $0xb8] sm:$0xf] %vm496_vm0, %v478_v59  ;;  %544 = vst.msk [vmem:[#allocation2 + $0xbc] sm:$0xf] %vm496_vm0, %v479_v60  ;;  %v3243_v61 = vld [vmem:[#allocation2 + $0x18] sm:$0xff]   ;;  %v2782_v62 = vld [vmem:[#allocation2 + $0x20] sm:$0xff]  }
  0x65   : > { %v3245_v63 = vld [vmem:[#allocation2 + $0x78] sm:$0xff]   ;;  %v3249_v1 = vld [vmem:[#allocation2 + $0x70] sm:$0xff]   ;;  %v2783_v2 = vld [vmem:[#allocation2 + $0x28] sm:$0xff]   ;;  %v3358_v51 = vshrl.u32 %v1954_v50, 7  ;;  %s2818_s27 = scalar_lea.vmem %s2096_s23, 128 }
  0x66   : > { %v2785_v0 = vld [vmem:[#allocation2 + $0x38] sm:$0xff]   ;;  %2492 = vmatprep.subr.bf16.mxu0 %v3245_v63  ;;  %v2784_v3 = vld [vmem:[#allocation2 + $0x30] sm:$0xff]   ;;  %v3252_v4 = vld [vmem:[#allocation2 + $0x68] sm:$0xff]   ;;  %p2819_p1 = scmp.ne.s32.totalorder %s2096_s23, %s2818_s27 }
  0x67   : > { %2493 = vmatpush3.bf16.msra.mxu0 %v2785_v0  ;;  %v3254_v5 = vld [vmem:[#allocation2 + $0x60] sm:$0xff]   ;;  %v482_v8 = vld [vmem:[%s3039_s30 + $0xc8] sm:$0xf]  ;;  %v483_v9 = vld [vmem:[%s3039_s30 + $0xcc] sm:$0xf]  ;;  %v1963_v53 = vsub.s32 1, %v3358_v51 }
  0x68   : > { %2494 = vmatprep.subr.bf16.mxu0 %v3249_v1  ;;  %v480_v6 = vld [vmem:[%s3039_s30 + $0xc0] sm:$0xf]  ;;  %v481_v7 = vld [vmem:[%s3039_s30 + $0xc4] sm:$0xf]  ;;  %547 = vst.msk [vmem:[#allocation2 + $0xc8] sm:$0xf] %vm496_vm0, %v482_v8  ;;  %p2820_p2 = pnand %p2819_p1, %p3005_p3 }
  0x69   : > { %545 = vst.msk [vmem:[#allocation2 + $0xc0] sm:$0xf] %vm496_vm0, %v480_v6  ;;  %546 = vst.msk [vmem:[#allocation2 + $0xc4] sm:$0xf] %vm496_vm0, %v481_v7  ;;  %v484_v10 = vld [vmem:[%s3039_s30 + $0xd0] sm:$0xf] }
  0x6a   : > { %v485_v11 = vld [vmem:[%s3039_s30 + $0xd4] sm:$0xf]  ;;  %548 = vst.msk [vmem:[#allocation2 + $0xcc] sm:$0xf] %vm496_vm0, %v483_v9  ;;  %549 = vst.msk [vmem:[#allocation2 + $0xd0] sm:$0xf] %vm496_vm0, %v484_v10  ;;  %p2821_p4 = pneg %p2820_p2 }
  0x6b   : > { %2557 = vmatmul.mubr.bf16.gmra.mxu0 %v3243_v61  ;;  %550 = vst.msk [vmem:[#allocation2 + $0xd4] sm:$0xf] %vm496_vm0, %v485_v11  ;;  %v486_v12 = vld [vmem:[%s3039_s30 + $0xd8] sm:$0xf]  ;;  %v487_v13 = vld [vmem:[%s3039_s30 + $0xdc] sm:$0xf] }
  0x6c   : > { %2560 = vmatprep.mubr.bf16.mxu0 %v2782_v62  ;;  %2495 = vmatpush3.bf16.msra.mxu0 %v2784_v3  ;;  %v488_v14 = vld [vmem:[%s3039_s30 + $0xe0] sm:$0xf]  ;;  %551 = vst.msk [vmem:[#allocation2 + $0xd8] sm:$0xf] %vm496_vm0, %v486_v12  ;;  %552 = vst.msk [vmem:[#allocation2 + $0xdc] sm:$0xf] %vm496_vm0, %v487_v13 }
  0x6d   : > { %2496 = vmatprep.subr.bf16.mxu0 %v3252_v4  ;;  %v489_v15 = vld [vmem:[%s3039_s30 + $0xe4] sm:$0xf]  ;;  %553 = vst.msk [vmem:[#allocation2 + $0xe0] sm:$0xf] %vm496_vm0, %v488_v14  ;;  %v490_v16 = vld [vmem:[%s3039_s30 + $0xe8] sm:$0xf] }
  0x6e   : > { %v491_v17 = vld [vmem:[%s3039_s30 + $0xec] sm:$0xf]  ;;  %v2789_v18 = vld [vmem:[#allocation2 + $0x58] sm:$0xff]   ;;  %554 = vst.msk [vmem:[#allocation2 + $0xe4] sm:$0xf] %vm496_vm0, %v489_v15  ;;  %v2786_v22 = vld [vmem:[#allocation2 + $0x40] sm:$0xff]  }
  0x6f   : > { %555 = vst.msk [vmem:[#allocation2 + $0xe8] sm:$0xf] %vm496_vm0, %v490_v16  ;;  %556 = vst.msk [vmem:[#allocation2 + $0xec] sm:$0xf] %vm496_vm0, %v491_v17  ;;  %v492_v19 = vld [vmem:[%s3039_s30 + $0xf0] sm:$0xf] }
  0x70   : > { %2497 = vmatpush3.bf16.msra.mxu0 %v2783_v2  ;;  %v493_v20 = vld [vmem:[%s3039_s30 + $0xf4] sm:$0xf]  ;;  %v494_v21 = vld [vmem:[%s3039_s30 + $0xf8] sm:$0xf]  ;;  %557 = vst.msk [vmem:[#allocation2 + $0xf0] sm:$0xf] %vm496_vm0, %v492_v19 }
  0x71   : > { %2498 = vmatprep.subr.bf16.mxu0 %v3254_v5  ;;  %558 = vst.msk [vmem:[#allocation2 + $0xf4] sm:$0xf] %vm496_vm0, %v493_v20  ;;  %v495_v23 = vld [vmem:[%s3039_s30 + $0xfc] sm:$0xf]  ;;  %559 = vst.msk [vmem:[#allocation2 + $0xf8] sm:$0xf] %vm496_vm0, %v494_v21 }
  0x72   : > { %560 = vst.msk [vmem:[#allocation2 + $0xfc] sm:$0xf] %vm496_vm0, %v495_v23  ;;  %v2810_v24 = vld [vmem:[%s3725_s4 + $0x38] sm:$0xff]   ;;  %v2811_v25 = vld [vmem:[%s3725_s4 + $0x30] sm:$0xff]   ;;  %v2787_v27 = vld [vmem:[#allocation2 + $0x48] sm:$0xff]   ;;  %v1959_v56 = vsub.s32 0, %v3358_v51 }
  0x73   : > { %2561 = vmatmul.mubr.bf16.gmra.mxu0 %v2783_v2  ;;  %2616 = vmatprep.subr.bf16.mxu1 %v2810_v24  ;;  %v2788_v26 = vld [vmem:[#allocation2 + $0x50] sm:$0xff]   ;;  %v2812_v28 = vld [vmem:[%s3725_s4 + $0x28] sm:$0xff]   ;;  %v2813_v29 = vld [vmem:[%s3725_s4 + $0x20] sm:$0xff]   ;;  %s2076_s30 = scalar_lea.sflag [#allocation4], %s3739_s19 }
  0x74   : > { %2564 = vmatprep.mubr.bf16.mxu0 %v2784_v3  ;;  %2499 = vmatpush3.bf16.msra.mxu0 %v2782_v62  ;;  %v2814_v30 = vld [vmem:[%s3725_s4 + $0x18] sm:$0xff]   ;;  %v3312_v31 = vld [vmem:[#allocation2 + $0x80] sm:$0xff]   ;;  %v3316_v33 = vld [vmem:[#allocation2 + $0x88] sm:$0xff]   ;;  %v2914_v3 = vmov 1.0|1.0  }
  0x75   : > { %2500 = vmatprep.subr.bf16.mxu0 %v2789_v18  ;;  %2617 = vmatpush3.bf16.msra.mxu1 %v2810_v24  ;;  %v3318_v34 = vld [vmem:[#allocation2 + $0x90] sm:$0xff]   ;;  %v2816_v36 = vld [vmem:[%s3725_s4 + $0x8] sm:$0xff]   ;;  %v3330_v37 = vld [vmem:[#allocation2 + $0xa0] sm:$0xff]  }
  0x76   : > { %2618 = vmatprep.subr.bf16.mxu1 %v2811_v25  ;;  %v2817_v38 = vld [vmem:[%s3725_s4] sm:$0xff]   ;;  %v3337_v40 = vld [vmem:[#allocation2 + $0xa8] sm:$0xff]   ;;  %v3339_v41 = vld [vmem:[#allocation2 + $0xb0] sm:$0xff]  }
  0x77   : > { %v2801_v42 = vld [vmem:[#allocation2 + $0xb8] sm:$0xff]   ;;  %v3343_v43 = vld [vmem:[#allocation2 + $0xc0] sm:$0xff]   ;;  %v3346_v44 = vld [vmem:[#allocation2 + $0xc8] sm:$0xff]  }
  0x78   : > { %2501 = vmatpush3.bf16.msra.mxu0 %v3243_v61  ;;  %v3348_v45 = vld [vmem:[#allocation2 + $0xd0] sm:$0xff]   ;;  %v3352_v46 = vld [vmem:[#allocation2 + $0xd8] sm:$0xff]   ;;  %v3354_v47 = vld [vmem:[#allocation2 + $0xe0] sm:$0xff]  }
  0x79   : > { %2502 = vmatprep.subr.bf16.mxu0 %v2788_v26  ;;  %2619 = vmatpush3.bf16.msra.mxu1 %v2811_v25  ;;  %v2807_v48 = vld [vmem:[#allocation2 + $0xe8] sm:$0xff]   ;;  %v2808_v49 = vld [vmem:[#allocation2 + $0xf0] sm:$0xff]   ;;  %v1956_v55 = vld [vmem:[%s338_s15] sm:$0xf] }
  0x7a   : > { %2620 = vmatprep.subr.bf16.mxu1 %v2812_v28  ;;  %v3370_v57 = vld [vmem:[%s3724_s3] ss:$0 sm:$0xff]  ;;  %v1964_v58 = vrot.slane %v1956_v55, %v1963_v53  ;;  %v1960_v60 = vrot.slane %v1956_v55, %v1959_v56 }
  0x7b   : > { %2565 = vmatmul.mubr.bf16.gmra.mxu0 %v2785_v0 }
  0x7c   : > { %2568 = vmatprep.mubr.bf16.mxu0 %v2786_v22  ;;  %2503 = vmatpush3.bf16.msra.mxu0 %v3194_v39  ;;  %v2809_v39 = vld [vmem:[#allocation2 + $0xf8] sm:$0xff]   ;;  %vm1974_vm1 = vcmp.eq.s32.totalorder %v3358_v51, %v1964_v58  ;;  %vm1973_vm3 = vcmp.eq.s32.totalorder %v3358_v51, %v1960_v60 }
  0x7d   : > { %2504 = vmatprep.subr.bf16.mxu0 %v2787_v27  ;;  %2621 = vmatpush3.bf16.msra.mxu1 %v2812_v28  ;;  %vm2336_vm2 = vmpackc.low %vm1974_vm1, %vm1974_vm1 }
  0x7e   : > { %2622 = vmatprep.subr.bf16.mxu1 %v2813_v29  ;;  %vm2338_vm4 = vmpackc.low %vm1973_vm3, %vm1973_vm3 }
  0x80   : > { %2505 = vmatpush3.bf16.msra.mxu0 %v3189_v35  ;;  %v3325_v35 = vld [vmem:[#allocation2 + $0x98] sm:$0xff]  }
  0x81   : > { %2506 = vmatprep.subr.bf16.mxu0 %v2786_v22  ;;  %2623 = vmatpush3.bf16.msra.mxu1 %v2813_v29 }
  0x82   : > { %2624 = vmatprep.subr.bf16.mxu1 %v2814_v30 }
  0x83   : > { %2569 = vmatmul.mubr.bf16.gmra.mxu0 %v2787_v27 }
  0x84   : > { %2572 = vmatprep.mubr.bf16.mxu0 %v2788_v26  ;;  %2507 = vmatpush3.bf16.msra.mxu0 %v3177_v32  ;;  %v2815_v32 = vld [vmem:[%s3725_s4 + $0x10] sm:$0xff]  }
  0x85   : > { %2625 = vmatpush3.bf16.msra.mxu1 %v2814_v30 }
  0x86   : > { %2626 = vmatprep.subr.bf16.mxu1 %v2815_v32 }
  0x89   : > { %2627 = vmatpush3.bf16.msra.mxu1 %v2815_v32 }
  0x8a   : > { %2628 = vmatprep.subr.bf16.mxu1 %v2816_v36 }
  0x8b   : > { %2573 = vmatmul.mubr.bf16.gmra.mxu0 %v2789_v18 }
  0x8c   : > { %2576 = vmatprep.mubr.bf16.mxu0 %v3254_v5 }
  0x8d   : > { %2629 = vmatpush3.bf16.msra.mxu1 %v2816_v36 }
  0x8e   : > { %2630 = vmatprep.subr.bf16.mxu1 %v2817_v38 }
  0x91   : > { %2631 = vmatpush3.bf16.msra.mxu1 %v2817_v38 }
  0x92   : > { %2514 = vmatprep.subr.bf16.mxu1 %v2809_v39 }
  0x93   : > { %2577 = vmatmul.mubr.bf16.gmra.mxu0 %v3252_v4  ;;  %v1967_v4 = vsub.s32 2, %v3358_v51 }
  0x94   : > { %2580 = vmatprep.mubr.bf16.mxu0 %v3249_v1  ;;  %v1971_v1 = vsub.s32 3, %v3358_v51 }
  0x95   : > { %v3384_v10 = vrot.slane %v1956_v55, %v1967_v4 }
  0x96   : > { %v3382_v7 = vrot.slane %v1956_v55, %v1971_v1 }
  0x97   : > { %vm1975_vm6 = vcmp.eq.s32.totalorder %v3358_v51, %v3384_v10 }
  0x98   : > { %vm1976_vm5 = vcmp.eq.s32.totalorder %v3358_v51, %v3382_v7  ;;  %vm2342_vm8 = vmpackc.low %vm1975_vm6, %vm1975_vm6  ;;  %v3475_v7 = vld [vmem:[%s3726_s5] ss:$0 sm:$0xff] }
  0x99   : > { %vm2340_vm7 = vmpackc.low %vm1976_vm5, %vm1976_vm5 }
  0x9b   : > { %2581 = vmatmul.mubr.bf16.gmra.mxu0 %v3245_v63 }
  0x9c   : > { %2584 = vmatprep.mubr.bf16.mxu0 %v3312_v31 }
  0xa3   : > { %2585 = vmatmul.mubr.bf16.gmra.mxu0 %v3316_v33 }
  0xa4   : > { %2588 = vmatprep.mubr.bf16.mxu0 %v3318_v34 }
  0xab   : > { %2589 = vmatmul.mubr.bf16.gmra.mxu0 %v3325_v35 }
  0xac   : > { %2592 = vmatprep.mubr.bf16.mxu0 %v3330_v37 }
  0xb3   : > { %2593 = vmatmul.mubr.bf16.gmra.mxu0 %v3337_v40 }
  0xb4   : > { %2596 = vmatprep.mubr.bf16.mxu0 %v3339_v41 }
  0xbb   : > { %2597 = vmatmul.mubr.bf16.gmra.mxu0 %v2801_v42 }
  0xbc   : > { %2600 = vmatprep.mubr.bf16.mxu0 %v3343_v43 }
  0xc3   : > { %2601 = vmatmul.mubr.bf16.gmra.mxu0 %v3346_v44 }
  0xc4   : > { %2604 = vmatprep.mubr.bf16.mxu0 %v3348_v45 }
  0xcb   : > { %2605 = vmatmul.mubr.bf16.gmra.mxu0 %v3352_v46 }
  0xcc   : > { %2608 = vmatprep.mubr.bf16.mxu0 %v3354_v47 }
  0xd3   : > { %2609 = vmatmul.mubr.bf16.gmra.mxu0 %v2807_v48 }
  0xd4   : > { %2612 = vmatprep.mubr.bf16.mxu0 %v2808_v49 }
  0xdb   : > { %2613 = vmatmul.mubr.bf16.gmra.mxu0 %v2809_v39 }
  0xdc   : > { %2337 = vmatprep.mubr.msk.bf16.mxu0 %vm2336_vm2, %v2914_v3 }
  0xe3   : > { %2339 = vmatmul.mubr.msk.bf16.vlgmr.msra.gmra.mxu0 %vm2338_vm4, %v2914_v3 }
 0x123   : > { %v2554_v52 = vpop.f32.mrf.mxu0 }
 0x124   : > { %v931_v63 = vadd.f32 %v2554_v52, %v3370_v57 }
 0x125   : > { %v922_v54 = vpop.f32.mrf.mxu0 }
 0x126   : > { %v923_v61 = vadd.f32 %v3370_v57, %v922_v54  ;;  %v1179_v11 = vmax.f32 %v931_v63, 0.0 }
 0x127   : > { %v2555_v59 = vpop.f32.mrf.mxu0 }
 0x128   : > { %v934_v62 = vadd.f32 %v2555_v59, %v3370_v57  ;;  %v1177_v8 = vmax.f32 %v923_v61, 0.0 }
 0x129   : > { %v925_v0 = vpop.f32.mrf.mxu0 }
 0x12a   : > { %v926_v2 = vadd.f32 %v3370_v57, %v925_v0  ;;  %v1180_v5 = vmax.f32 %v934_v62, 0.0 }
 0x12b   : > { %v2558_v6 = vpop.f32.mrf.mxu0 }
 0x12c   : > { %v1178_v9 = vmax.f32 %v926_v2, 0.0  ;;  %v1242_v14 = vpack.c.bf16 %v1180_v5, %v1179_v11  ;;  %v947_v18 = vadd.f32 %v2558_v6, %v3370_v57 }
 0x12d   : > { %v938_v12 = vpop.f32.mrf.mxu0 }
 0x12e   : > { %v1241_v13 = vpack.c.bf16 %v1178_v9, %v1177_v8  ;;  %v939_v16 = vadd.f32 %v3370_v57, %v938_v12  ;;  %v1183_v25 = vmax.f32 %v947_v18, 0.0 }
 0x12f   : > { %v2559_v15 = vpop.f32.mrf.mxu0 }
 0x130   : > { %v950_v17 = vadd.f32 %v2559_v15, %v3370_v57  ;;  %2632 = vmatprep.mubr.bf16.mxu1 %v1241_v13  ;;  %v1181_v23 = vmax.f32 %v939_v16, 0.0 }
 0x131   : > { %v941_v19 = vpop.f32.mrf.mxu0  ;;  %2633 = vmatmul.mubr.bf16.vlgmr.msra.gmra.mxu1 %v1242_v14 }
 0x132   : > { %v942_v20 = vadd.f32 %v3370_v57, %v941_v19  ;;  %2515 = vmatpush3.bf16.msra.mxu1 %v2801_v42  ;;  %v1184_v21 = vmax.f32 %v950_v17, 0.0 }
 0x133   : > { %v2562_v22 = vpop.f32.mrf.mxu0  ;;  %2516 = vmatprep.subr.bf16.mxu1 %v2808_v49 }
 0x134   : > { %v1182_v24 = vmax.f32 %v942_v20, 0.0  ;;  %v1244_v28 = vpack.c.bf16 %v1184_v21, %v1183_v25  ;;  %v963_v36 = vadd.f32 %v2562_v22, %v3370_v57 }
 0x135   : > { %v954_v26 = vpop.f32.mrf.mxu0 }
 0x136   : > { %v1243_v27 = vpack.c.bf16 %v1182_v24, %v1181_v23  ;;  %2517 = vmatpush3.bf16.msra.mxu1 %v3339_v41  ;;  %v955_v30 = vadd.f32 %v3370_v57, %v954_v26 }
 0x137   : > { %v2563_v29 = vpop.f32.mrf.mxu0  ;;  %2518 = vmatprep.subr.bf16.mxu1 %v2807_v48  ;;  %v1187_v48 = vmax.f32 %v963_v36, 0.0 }
 0x138   : > { %v966_v32 = vadd.f32 %v2563_v29, %v3370_v57  ;;  %2636 = vmatprep.mubr.bf16.mxu1 %v1243_v27  ;;  %v1185_v41 = vmax.f32 %v955_v30, 0.0 }
 0x139   : > { %v957_v38 = vpop.f32.mrf.mxu0  ;;  %2637 = vmatmul.mubr.bf16.gmra.mxu1 %v1244_v28 }
 0x13a   : > { %v958_v39 = vadd.f32 %v3370_v57, %v957_v38  ;;  %2519 = vmatpush3.bf16.msra.mxu1 %v3337_v40  ;;  %v1188_v42 = vmax.f32 %v966_v32, 0.0 }
 0x13b   : > { %v2566_v49 = vpop.f32.mrf.mxu0  ;;  %2520 = vmatprep.subr.bf16.mxu1 %v3354_v47 }
 0x13c   : > { %v1186_v50 = vmax.f32 %v958_v39, 0.0  ;;  %v1246_v54 = vpack.c.bf16 %v1188_v42, %v1187_v48  ;;  %v979_v40 = vadd.f32 %v2566_v49, %v3370_v57 }
 0x13d   : > { %v970_v52 = vpop.f32.mrf.mxu0 }
 0x13e   : > { %v1245_v53 = vpack.c.bf16 %v1186_v50, %v1185_v41  ;;  %2521 = vmatpush3.bf16.msra.mxu1 %v3330_v37  ;;  %v971_v56 = vadd.f32 %v3370_v57, %v970_v52 }
 0x13f   : > { %v2567_v55 = vpop.f32.mrf.mxu0  ;;  %2522 = vmatprep.subr.bf16.mxu1 %v3352_v46  ;;  %v1191_v46 = vmax.f32 %v979_v40, 0.0 }
 0x140   : > { %v982_v58 = vadd.f32 %v2567_v55, %v3370_v57  ;;  %2640 = vmatprep.mubr.bf16.mxu1 %v1245_v53  ;;  %v1189_v37 = vmax.f32 %v971_v56, 0.0 }
 0x141   : > { %v973_v59 = vpop.f32.mrf.mxu0  ;;  %2641 = vmatmul.mubr.bf16.gmra.mxu1 %v1246_v54 }
 0x142   : > { %v974_v47 = vadd.f32 %v3370_v57, %v973_v59  ;;  %2523 = vmatpush3.bf16.msra.mxu1 %v3325_v35  ;;  %v1192_v60 = vmax.f32 %v982_v58, 0.0 }
 0x143   : > { %v2570_v61 = vpop.f32.mrf.mxu0  ;;  %2524 = vmatprep.subr.bf16.mxu1 %v3348_v45 }
 0x144   : > { %v1190_v62 = vmax.f32 %v974_v47, 0.0  ;;  %v1248_v1 = vpack.c.bf16 %v1192_v60, %v1191_v46  ;;  %v995_v35 = vadd.f32 %v2570_v61, %v3370_v57 }
 0x145   : > { %v986_v63 = vpop.f32.mrf.mxu0 }
 0x146   : > { %v1247_v0 = vpack.c.bf16 %v1190_v62, %v1189_v37  ;;  %2525 = vmatpush3.bf16.msra.mxu1 %v3318_v34  ;;  %v987_v4 = vadd.f32 %v3370_v57, %v986_v63 }
 0x147   : > { %v2571_v2 = vpop.f32.mrf.mxu0  ;;  %2526 = vmatprep.subr.bf16.mxu1 %v3346_v44  ;;  %v1195_v44 = vmax.f32 %v995_v35, 0.0 }
 0x148   : > { %v998_v5 = vadd.f32 %v2571_v2, %v3370_v57  ;;  %2644 = vmatprep.mubr.bf16.mxu1 %v1247_v0  ;;  %v1193_v34 = vmax.f32 %v987_v4, 0.0 }
 0x149   : > { %v989_v6 = vpop.f32.mrf.mxu0  ;;  %2645 = vmatmul.mubr.bf16.gmra.mxu1 %v1248_v1 }
 0x14a   : > { %v990_v45 = vadd.f32 %v3370_v57, %v989_v6  ;;  %2527 = vmatpush3.bf16.msra.mxu1 %v3316_v33  ;;  %v1196_v8 = vmax.f32 %v998_v5, 0.0 }
 0x14b   : > { %v2574_v9 = vpop.f32.mrf.mxu0  ;;  %2528 = vmatprep.subr.bf16.mxu1 %v3343_v43 }
 0x14c   : > { %v1194_v11 = vmax.f32 %v990_v45, 0.0  ;;  %v1250_v14 = vpack.c.bf16 %v1196_v8, %v1195_v44  ;;  %v1011_v33 = vadd.f32 %v2574_v9, %v3370_v57 }
 0x14d   : > { %v1002_v12 = vpop.f32.mrf.mxu0 }
 0x14e   : > { %v1249_v13 = vpack.c.bf16 %v1194_v11, %v1193_v34  ;;  %2529 = vmatpush3.bf16.msra.mxu1 %v3312_v31  ;;  %v1003_v16 = vadd.f32 %v3370_v57, %v1002_v12  ;;  %v1199_v23 = vmax.f32 %v1011_v33, 0.0 }
 0x14f   : > { %v2575_v15 = vpop.f32.mrf.mxu0 }
 0x150   : > { %v1014_v17 = vadd.f32 %v2575_v15, %v3370_v57  ;;  %2648 = vmatprep.mubr.bf16.mxu1 %v1249_v13  ;;  %v1197_v21 = vmax.f32 %v1003_v16, 0.0 }
 0x151   : > { %v1005_v18 = vpop.f32.mrf.mxu0  ;;  %2649 = vmatmul.mubr.bf16.gmra.mxu1 %v1250_v14 }
 0x152   : > { %v1006_v43 = vadd.f32 %v3370_v57, %v1005_v18  ;;  %v1200_v19 = vmax.f32 %v1014_v17, 0.0 }
 0x153   : > { %v2578_v20 = vpop.f32.mrf.mxu0 }
 0x154   : > { %v1198_v22 = vmax.f32 %v1006_v43, 0.0  ;;  %v1252_v25 = vpack.c.bf16 %v1200_v19, %v1199_v23  ;;  %v1027_v29 = vadd.f32 %v2578_v20, %v3370_v57 }
 0x155   : > { %v1018_v24 = vpop.f32.mrf.mxu0 }
 0x156   : > { %v1251_v31 = vpack.c.bf16 %v1198_v22, %v1197_v21  ;;  %v1019_v27 = vadd.f32 %v3370_v57, %v1018_v24  ;;  %v1203_v49 = vmax.f32 %v1027_v29, 0.0 }
 0x157   : > { %v2579_v26 = vpop.f32.mrf.mxu0 }
 0x158   : > { %v1030_v28 = vadd.f32 %v2579_v26, %v3370_v57  ;;  %2652 = vmatprep.mubr.bf16.mxu1 %v1251_v31  ;;  %v1201_v39 = vmax.f32 %v1019_v27, 0.0 }
 0x159   : > { %v1021_v30 = vpop.f32.mrf.mxu0  ;;  %2653 = vmatmul.mubr.bf16.gmra.mxu1 %v1252_v25 }
 0x15a   : > { %v1022_v32 = vadd.f32 %v3370_v57, %v1021_v30  ;;  %v1204_v36 = vmax.f32 %v1030_v28, 0.0 }
 0x15b   : > { %v2582_v38 = vpop.f32.mrf.mxu0 }
 0x15c   : > { %v1202_v42 = vmax.f32 %v1022_v32, 0.0  ;;  %v1254_v48 = vpack.c.bf16 %v1204_v36, %v1203_v49  ;;  %v1043_v55 = vadd.f32 %v2582_v38, %v3370_v57 }
 0x15d   : > { %v1034_v41 = vpop.f32.mrf.mxu0 }
 0x15e   : > { %v1253_v50 = vpack.c.bf16 %v1202_v42, %v1201_v39  ;;  %v1035_v53 = vadd.f32 %v3370_v57, %v1034_v41  ;;  %v1207_v61 = vmax.f32 %v1043_v55, 0.0 }
 0x15f   : > { %v2583_v52 = vpop.f32.mrf.mxu0 }
 0x160   : > { %v1046_v54 = vadd.f32 %v2583_v52, %v3370_v57  ;;  %2656 = vmatprep.mubr.bf16.mxu1 %v1253_v50  ;;  %v1205_v47 = vmax.f32 %v1035_v53, 0.0 }
 0x161   : > { %v1037_v56 = vpop.f32.mrf.mxu0  ;;  %2657 = vmatmul.mubr.bf16.gmra.mxu1 %v1254_v48 }
 0x162   : > { %v1038_v58 = vadd.f32 %v3370_v57, %v1037_v56  ;;  %v1208_v40 = vmax.f32 %v1046_v54, 0.0 }
 0x163   : > { %v2586_v59 = vpop.f32.mrf.mxu0 }
 0x164   : > { %v1206_v60 = vmax.f32 %v1038_v58, 0.0  ;;  %v1256_v46 = vpack.c.bf16 %v1208_v40, %v1207_v61  ;;  %v1059_v2 = vadd.f32 %v2586_v59, %v3370_v57 }
 0x165   : > { %v1050_v37 = vpop.f32.mrf.mxu0 }
 0x166   : > { %v1255_v62 = vpack.c.bf16 %v1206_v60, %v1205_v47  ;;  %v1051_v0 = vadd.f32 %v3370_v57, %v1050_v37  ;;  %v1211_v9 = vmax.f32 %v1059_v2, 0.0 }
 0x167   : > { %v2587_v63 = vpop.f32.mrf.mxu0 }
 0x168   : > { %v1062_v1 = vadd.f32 %v2587_v63, %v3370_v57  ;;  %2660 = vmatprep.mubr.bf16.mxu1 %v1255_v62  ;;  %v1209_v45 = vmax.f32 %v1051_v0, 0.0 }
 0x169   : > { %v1053_v4 = vpop.f32.mrf.mxu0  ;;  %2661 = vmatmul.mubr.bf16.gmra.mxu1 %v1256_v46 }
 0x16a   : > { %v1054_v5 = vadd.f32 %v3370_v57, %v1053_v4  ;;  %v1212_v35 = vmax.f32 %v1062_v1, 0.0 }
 0x16b   : > { %v2590_v6 = vpop.f32.mrf.mxu0 }
 0x16c   : > { %v1210_v8 = vmax.f32 %v1054_v5, 0.0  ;;  %v1258_v44 = vpack.c.bf16 %v1212_v35, %v1211_v9  ;;  %v1075_v15 = vadd.f32 %v2590_v6, %v3370_v57 }
 0x16d   : > { %v1066_v34 = vpop.f32.mrf.mxu0 }
 0x16e   : > { %v1257_v11 = vpack.c.bf16 %v1210_v8, %v1209_v45  ;;  %v1067_v13 = vadd.f32 %v3370_v57, %v1066_v34  ;;  %v1215_v20 = vmax.f32 %v1075_v15, 0.0 }
 0x16f   : > { %v2591_v12 = vpop.f32.mrf.mxu0 }
 0x170   : > { %v1078_v14 = vadd.f32 %v2591_v12, %v3370_v57  ;;  %2664 = vmatprep.mubr.bf16.mxu1 %v1257_v11  ;;  %v1213_v43 = vmax.f32 %v1067_v13, 0.0 }
 0x171   : > { %v1069_v16 = vpop.f32.mrf.mxu0  ;;  %2665 = vmatmul.mubr.bf16.gmra.mxu1 %v1258_v44 }
 0x172   : > { %v1070_v17 = vadd.f32 %v3370_v57, %v1069_v16  ;;  %v1216_v33 = vmax.f32 %v1078_v14, 0.0 }
 0x173   : > { %v2594_v18 = vpop.f32.mrf.mxu0 }
 0x174   : > { %v1214_v19 = vmax.f32 %v1070_v17, 0.0  ;;  %v1260_v23 = vpack.c.bf16 %v1216_v33, %v1215_v20  ;;  %v1091_v26 = vadd.f32 %v2594_v18, %v3370_v57 }
 0x175   : > { %v1082_v21 = vpop.f32.mrf.mxu0 }
 0x176   : > { %v1259_v22 = vpack.c.bf16 %v1214_v19, %v1213_v43  ;;  %v1083_v31 = vadd.f32 %v3370_v57, %v1082_v21  ;;  %v1219_v38 = vmax.f32 %v1091_v26, 0.0 }
 0x177   : > { %v2595_v24 = vpop.f32.mrf.mxu0 }
 0x178   : > { %v1094_v25 = vadd.f32 %v2595_v24, %v3370_v57  ;;  %2668 = vmatprep.mubr.bf16.mxu1 %v1259_v22  ;;  %v1217_v32 = vmax.f32 %v1083_v31, 0.0 }
 0x179   : > { %v1085_v27 = vpop.f32.mrf.mxu0  ;;  %2669 = vmatmul.mubr.bf16.gmra.mxu1 %v1260_v23 }
 0x17a   : > { %v1086_v28 = vadd.f32 %v3370_v57, %v1085_v27  ;;  %v1220_v29 = vmax.f32 %v1094_v25, 0.0 }
 0x17b   : > { %v2598_v30 = vpop.f32.mrf.mxu0 }
 0x17c   : > { %v1218_v36 = vmax.f32 %v1086_v28, 0.0  ;;  %v1262_v49 = vpack.c.bf16 %v1220_v29, %v1219_v38  ;;  %v1107_v52 = vadd.f32 %v2598_v30, %v3370_v57 }
 0x17d   : > { %v1098_v39 = vpop.f32.mrf.mxu0 }
 0x17e   : > { %v1261_v42 = vpack.c.bf16 %v1218_v36, %v1217_v32  ;;  %v1099_v50 = vadd.f32 %v3370_v57, %v1098_v39  ;;  %v1223_v59 = vmax.f32 %v1107_v52, 0.0 }
 0x17f   : > { %v2599_v41 = vpop.f32.mrf.mxu0 }
 0x180   : > { %v1110_v48 = vadd.f32 %v2599_v41, %v3370_v57  ;;  %2672 = vmatprep.mubr.bf16.mxu1 %v1261_v42  ;;  %v1221_v58 = vmax.f32 %v1099_v50, 0.0 }
 0x181   : > { %v1101_v53 = vpop.f32.mrf.mxu0  ;;  %2673 = vmatmul.mubr.bf16.gmra.mxu1 %v1262_v49 }
 0x182   : > { %v1102_v54 = vadd.f32 %v3370_v57, %v1101_v53  ;;  %v1224_v55 = vmax.f32 %v1110_v48, 0.0 }
 0x183   : > { %v2602_v56 = vpop.f32.mrf.mxu0 }
 0x184   : > { %v1222_v40 = vmax.f32 %v1102_v54, 0.0  ;;  %v1264_v61 = vpack.c.bf16 %v1224_v55, %v1223_v59  ;;  %v1123_v63 = vadd.f32 %v2602_v56, %v3370_v57 }
 0x185   : > { %v1114_v47 = vpop.f32.mrf.mxu0 }
 0x186   : > { %v1263_v60 = vpack.c.bf16 %v1222_v40, %v1221_v58  ;;  %v1115_v62 = vadd.f32 %v3370_v57, %v1114_v47  ;;  %v1227_v6 = vmax.f32 %v1123_v63, 0.0 }
 0x187   : > { %v2603_v37 = vpop.f32.mrf.mxu0 }
 0x188   : > { %v1126_v46 = vadd.f32 %v2603_v37, %v3370_v57  ;;  %2676 = vmatprep.mubr.bf16.mxu1 %v1263_v60  ;;  %v1225_v5 = vmax.f32 %v1115_v62, 0.0 }
 0x189   : > { %v1117_v0 = vpop.f32.mrf.mxu0  ;;  %2677 = vmatmul.mubr.bf16.gmra.mxu1 %v1264_v61 }
 0x18a   : > { %v1118_v1 = vadd.f32 %v3370_v57, %v1117_v0  ;;  %v1228_v2 = vmax.f32 %v1126_v46, 0.0 }
 0x18b   : > { %v2606_v4 = vpop.f32.mrf.mxu0 }
 0x18c   : > { %v1226_v35 = vmax.f32 %v1118_v1, 0.0  ;;  %v1266_v9 = vpack.c.bf16 %v1228_v2, %v1227_v6  ;;  %v1139_v12 = vadd.f32 %v2606_v4, %v3370_v57 }
 0x18d   : > { %v1130_v45 = vpop.f32.mrf.mxu0 }
 0x18e   : > { %v1265_v8 = vpack.c.bf16 %v1226_v35, %v1225_v5  ;;  %v1131_v11 = vadd.f32 %v3370_v57, %v1130_v45  ;;  %v1231_v18 = vmax.f32 %v1139_v12, 0.0 }
 0x18f   : > { %v2607_v34 = vpop.f32.mrf.mxu0 }
 0x190   : > { %v1142_v44 = vadd.f32 %v2607_v34, %v3370_v57  ;;  %2680 = vmatprep.mubr.bf16.mxu1 %v1265_v8  ;;  %v1229_v17 = vmax.f32 %v1131_v11, 0.0 }
 0x191   : > { %v1133_v13 = vpop.f32.mrf.mxu0  ;;  %2681 = vmatmul.mubr.bf16.gmra.mxu1 %v1266_v9 }
 0x192   : > { %v1134_v14 = vadd.f32 %v3370_v57, %v1133_v13  ;;  %v1232_v15 = vmax.f32 %v1142_v44, 0.0 }
 0x193   : > { %v2610_v16 = vpop.f32.mrf.mxu0 }
 0x194   : > { %v1230_v33 = vmax.f32 %v1134_v14, 0.0  ;;  %v1268_v20 = vpack.c.bf16 %v1232_v15, %v1231_v18  ;;  %v1155_v24 = vadd.f32 %v2610_v16, %v3370_v57 }
 0x195   : > { %v1146_v43 = vpop.f32.mrf.mxu0 }
 0x196   : > { %v1267_v19 = vpack.c.bf16 %v1230_v33, %v1229_v17  ;;  %v1147_v22 = vadd.f32 %v3370_v57, %v1146_v43  ;;  %v1235_v30 = vmax.f32 %v1155_v24, 0.0 }
 0x197   : > { %v2611_v21 = vpop.f32.mrf.mxu0 }
 0x198   : > { %v1158_v23 = vadd.f32 %v2611_v21, %v3370_v57  ;;  %2684 = vmatprep.mubr.bf16.mxu1 %v1267_v19  ;;  %v1233_v28 = vmax.f32 %v1147_v22, 0.0 }
 0x199   : > { %v1149_v31 = vpop.f32.mrf.mxu0  ;;  %2685 = vmatmul.mubr.bf16.gmra.mxu1 %v1268_v20 }
 0x19a   : > { %v1150_v25 = vadd.f32 %v3370_v57, %v1149_v31  ;;  %v1236_v26 = vmax.f32 %v1158_v23, 0.0 }
 0x19b   : > { %v2614_v27 = vpop.f32.mrf.mxu0 }
 0x19c   : > { %v1234_v29 = vmax.f32 %v1150_v25, 0.0  ;;  %v1270_v38 = vpack.c.bf16 %v1236_v26, %v1235_v30  ;;  %v1171_v41 = vadd.f32 %v2614_v27, %v3370_v57 }
 0x19d   : > { %v1162_v32 = vpop.f32.mrf.mxu0 }
 0x19e   : > { %v1269_v36 = vpack.c.bf16 %v1234_v29, %v1233_v28  ;;  %v1163_v42 = vadd.f32 %v3370_v57, %v1162_v32  ;;  %v1239_v55 = vmax.f32 %v1171_v41, 0.0 }
 0x19f   : > { %v2615_v39 = vpop.f32.mrf.mxu0 }
 0x1a0   : > { %v1174_v49 = vadd.f32 %v2615_v39, %v3370_v57  ;;  %2688 = vmatprep.mubr.bf16.mxu1 %v1269_v36  ;;  %v1237_v53 = vmax.f32 %v1163_v42, 0.0 }
 0x1a1   : > { %v1165_v50 = vpop.f32.mrf.mxu0  ;;  %2689 = vmatmul.mubr.bf16.gmra.mxu1 %v1270_v38 }
 0x1a2   : > { %v1166_v48 = vadd.f32 %v3370_v57, %v1165_v50  ;;  %v1240_v52 = vmax.f32 %v1174_v49, 0.0 }
 0x1a3   : > { %v2508_v57 = vpop.f32.mrf.mxu0 }
 0x1a4   : > { %v1238_v54 = vmax.f32 %v1166_v48, 0.0  ;;  %v1272_v58 = vpack.c.bf16 %v1240_v52, %v1239_v55 }
 0x1a5   : > { %v2509_v40 = vpop.f32.mrf.mxu0 }
 0x1a6   : > { %v1271_v56 = vpack.c.bf16 %v1238_v54, %v1237_v53  ;;  %v3478_v51 = vadd.f32 %v2509_v40, %v2508_v57 }
 0x1a7   : > { %v2511_v59 = vpop.f32.mrf.mxu0 }
 0x1a8   : > { %2692 = vmatprep.mubr.bf16.mxu1 %v1271_v56 }
 0x1a9   : > { %2693 = vmatmul.mubr.bf16.gmra.mxu1 %v1272_v58  ;;  %v2512_v60 = vpop.f32.mrf.mxu0 }
 0x1aa   : > { %2341 = vmatprep.mubr.msk.bf16.mxu1 %vm2340_vm7, %v2914_v3 }
 0x1b1   : > { %2343 = vmatmul.mubr.msk.bf16.vlgmr.msra.gmra.mxu1 %vm2342_vm8, %v2914_v3 }
 0x1f1   : > { %v2634_v47 = vpop.f32.mrf.mxu1 }
 0x1f2   : > { %v1387_v61 = vadd.f32 %v2634_v47, %v3475_v7 }
 0x1f3   : > { %v1378_v10 = vpop.f32.mrf.mxu1 }
 0x1f4   : > { %v2350_v3 = vpack.c.bf16 %v1387_v61, %v1387_v61  ;;  %v1379_v37 = vadd.f32 %v3475_v7, %v1378_v10 }
 0x1f5   : > { %v2635_v62 = vpop.f32.mrf.mxu1 }
 0x1f6   : > { %1892 = vst.msk [vmem:[%s3044_s29 + $0x8] sm:$0xf] %vm1889_vm9, %v2350_v3  ;;  %v2348_v46 = vpack.c.bf16 %v1379_v37, %v1379_v37  ;;  %v1390_v63 = vadd.f32 %v2635_v62, %v3475_v7 }
 0x1f7   : > { %v1381_v0 = vpop.f32.mrf.mxu1 }
 0x1f8   : > { %1890 = vst.msk [vmem:[%s3044_s29] sm:$0xf] %vm1889_vm9, %v2348_v46  ;;  %v2351_v1 = vpack.c.bf16 %v1390_v63, %v1390_v63  ;;  %v1382_v2 = vadd.f32 %v3475_v7, %v1381_v0 }
 0x1f9   : > { %v2638_v4 = vpop.f32.mrf.mxu1 }
 0x1fa   : > { %1893 = vst.msk [vmem:[%s3044_s29 + $0xc] sm:$0xf] %vm1889_vm9, %v2351_v1  ;;  %v2349_v5 = vpack.c.bf16 %v1382_v2, %v1382_v2  ;;  %v1403_v35 = vadd.f32 %v2638_v4, %v3475_v7 }
 0x1fb   : > { %v1394_v6 = vpop.f32.mrf.mxu1 }
 0x1fc   : > { %1891 = vst.msk [vmem:[%s3044_s29 + $0x4] sm:$0xf] %vm1889_vm9, %v2349_v5  ;;  %v2354_v45 = vpack.c.bf16 %v1403_v35, %v1403_v35  ;;  %v1395_v8 = vadd.f32 %v3475_v7, %v1394_v6 }
 0x1fd   : > { %v2639_v9 = vpop.f32.mrf.mxu1 }
 0x1fe   : > { %1896 = vst.msk [vmem:[%s3044_s29 + $0x18] sm:$0xf] %vm1889_vm9, %v2354_v45  ;;  %v2352_v34 = vpack.c.bf16 %v1395_v8, %v1395_v8  ;;  %v1406_v11 = vadd.f32 %v2639_v9, %v3475_v7 }
 0x1ff   : > { %v1397_v44 = vpop.f32.mrf.mxu1 }
 0x200   : > { %1894 = vst.msk [vmem:[%s3044_s29 + $0x10] sm:$0xf] %vm1889_vm9, %v2352_v34  ;;  %v2355_v12 = vpack.c.bf16 %v1406_v11, %v1406_v11  ;;  %v1398_v13 = vadd.f32 %v3475_v7, %v1397_v44 }
 0x201   : > { %v2642_v14 = vpop.f32.mrf.mxu1 }
 0x202   : > { %1897 = vst.msk [vmem:[%s3044_s29 + $0x1c] sm:$0xf] %vm1889_vm9, %v2355_v12  ;;  %v2353_v15 = vpack.c.bf16 %v1398_v13, %v1398_v13  ;;  %v1419_v16 = vadd.f32 %v2642_v14, %v3475_v7 }
 0x203   : > { %v1410_v17 = vpop.f32.mrf.mxu1 }
 0x204   : > { %1895 = vst.msk [vmem:[%s3044_s29 + $0x14] sm:$0xf] %vm1889_vm9, %v2353_v15  ;;  %v2358_v33 = vpack.c.bf16 %v1419_v16, %v1419_v16  ;;  %v1411_v18 = vadd.f32 %v3475_v7, %v1410_v17 }
 0x205   : > { %v2643_v43 = vpop.f32.mrf.mxu1 }
 0x206   : > { %1900 = vst.msk [vmem:[%s3044_s29 + $0x28] sm:$0xf] %vm1889_vm9, %v2358_v33  ;;  %v2356_v19 = vpack.c.bf16 %v1411_v18, %v1411_v18  ;;  %v1422_v20 = vadd.f32 %v2643_v43, %v3475_v7 }
 0x207   : > { %v1413_v21 = vpop.f32.mrf.mxu1 }
 0x208   : > { %1898 = vst.msk [vmem:[%s3044_s29 + $0x20] sm:$0xf] %vm1889_vm9, %v2356_v19  ;;  %v2359_v22 = vpack.c.bf16 %v1422_v20, %v1422_v20  ;;  %v1414_v23 = vadd.f32 %v3475_v7, %v1413_v21 }
 0x209   : > { %v2646_v24 = vpop.f32.mrf.mxu1 }
 0x20a   : > { %1901 = vst.msk [vmem:[%s3044_s29 + $0x2c] sm:$0xf] %vm1889_vm9, %v2359_v22  ;;  %v2357_v31 = vpack.c.bf16 %v1414_v23, %v1414_v23  ;;  %v1435_v25 = vadd.f32 %v2646_v24, %v3475_v7 }
 0x20b   : > { %v1426_v26 = vpop.f32.mrf.mxu1 }
 0x20c   : > { %1899 = vst.msk [vmem:[%s3044_s29 + $0x24] sm:$0xf] %vm1889_vm9, %v2357_v31  ;;  %v2362_v27 = vpack.c.bf16 %v1435_v25, %v1435_v25  ;;  %v1427_v28 = vadd.f32 %v3475_v7, %v1426_v26 }
 0x20d   : > { %v2647_v29 = vpop.f32.mrf.mxu1 }
 0x20e   : > { %1904 = vst.msk [vmem:[%s3044_s29 + $0x38] sm:$0xf] %vm1889_vm9, %v2362_v27  ;;  %v2360_v30 = vpack.c.bf16 %v1427_v28, %v1427_v28  ;;  %v1438_v32 = vadd.f32 %v2647_v29, %v3475_v7 }
 0x20f   : > { %v1429_v36 = vpop.f32.mrf.mxu1 }
 0x210   : > { %1902 = vst.msk [vmem:[%s3044_s29 + $0x30] sm:$0xf] %vm1889_vm9, %v2360_v30  ;;  %v2363_v38 = vpack.c.bf16 %v1438_v32, %v1438_v32  ;;  %v1430_v39 = vadd.f32 %v3475_v7, %v1429_v36 }
 0x211   : > { %v2650_v42 = vpop.f32.mrf.mxu1 }
 0x212   : > { %1905 = vst.msk [vmem:[%s3044_s29 + $0x3c] sm:$0xf] %vm1889_vm9, %v2363_v38  ;;  %v2361_v49 = vpack.c.bf16 %v1430_v39, %v1430_v39  ;;  %v1451_v41 = vadd.f32 %v2650_v42, %v3475_v7 }
 0x213   : > { %v1442_v50 = vpop.f32.mrf.mxu1 }
 0x214   : > { %1903 = vst.msk [vmem:[%s3044_s29 + $0x34] sm:$0xf] %vm1889_vm9, %v2361_v49  ;;  %v2366_v48 = vpack.c.bf16 %v1451_v41, %v1451_v41  ;;  %v1443_v52 = vadd.f32 %v3475_v7, %v1442_v50 }
 0x215   : > { %v2651_v53 = vpop.f32.mrf.mxu1 }
 0x216   : > { %1908 = vst.msk [vmem:[%s3044_s29 + $0x48] sm:$0xf] %vm1889_vm9, %v2366_v48  ;;  %v2364_v54 = vpack.c.bf16 %v1443_v52, %v1443_v52  ;;  %v1454_v55 = vadd.f32 %v2651_v53, %v3475_v7 }
 0x217   : > { %v1445_v56 = vpop.f32.mrf.mxu1 }
 0x218   : > { %1906 = vst.msk [vmem:[%s3044_s29 + $0x40] sm:$0xf] %vm1889_vm9, %v2364_v54  ;;  %v2367_v58 = vpack.c.bf16 %v1454_v55, %v1454_v55  ;;  %v1446_v57 = vadd.f32 %v3475_v7, %v1445_v56 }
 0x219   : > { %v2654_v40 = vpop.f32.mrf.mxu1 }
 0x21a   : > { %1909 = vst.msk [vmem:[%s3044_s29 + $0x4c] sm:$0xf] %vm1889_vm9, %v2367_v58  ;;  %v2365_v59 = vpack.c.bf16 %v1446_v57, %v1446_v57  ;;  %v1467_v47 = vadd.f32 %v2654_v40, %v3475_v7 }
 0x21b   : > { %v1458_v60 = vpop.f32.mrf.mxu1 }
 0x21c   : > { %1907 = vst.msk [vmem:[%s3044_s29 + $0x44] sm:$0xf] %vm1889_vm9, %v2365_v59  ;;  %v2370_v61 = vpack.c.bf16 %v1467_v47, %v1467_v47  ;;  %v1459_v10 = vadd.f32 %v3475_v7, %v1458_v60 }
 0x21d   : > { %v2655_v3 = vpop.f32.mrf.mxu1 }
 0x21e   : > { %1912 = vst.msk [vmem:[%s3044_s29 + $0x58] sm:$0xf] %vm1889_vm9, %v2370_v61  ;;  %v2368_v37 = vpack.c.bf16 %v1459_v10, %v1459_v10  ;;  %v1470_v62 = vadd.f32 %v2655_v3, %v3475_v7 }
 0x21f   : > { %v1461_v46 = vpop.f32.mrf.mxu1 }
 0x220   : > { %1910 = vst.msk [vmem:[%s3044_s29 + $0x50] sm:$0xf] %vm1889_vm9, %v2368_v37  ;;  %v2371_v63 = vpack.c.bf16 %v1470_v62, %v1470_v62  ;;  %v1462_v0 = vadd.f32 %v3475_v7, %v1461_v46 }
 0x221   : > { %v2658_v1 = vpop.f32.mrf.mxu1 }
 0x222   : > { %1913 = vst.msk [vmem:[%s3044_s29 + $0x5c] sm:$0xf] %vm1889_vm9, %v2371_v63  ;;  %v2369_v2 = vpack.c.bf16 %v1462_v0, %v1462_v0  ;;  %v1483_v4 = vadd.f32 %v2658_v1, %v3475_v7 }
 0x223   : > { %v1474_v5 = vpop.f32.mrf.mxu1 }
 0x224   : > { %1911 = vst.msk [vmem:[%s3044_s29 + $0x54] sm:$0xf] %vm1889_vm9, %v2369_v2  ;;  %v2374_v35 = vpack.c.bf16 %v1483_v4, %v1483_v4  ;;  %v1475_v6 = vadd.f32 %v3475_v7, %v1474_v5 }
 0x225   : > { %v2659_v45 = vpop.f32.mrf.mxu1 }
 0x226   : > { %1916 = vst.msk [vmem:[%s3044_s29 + $0x68] sm:$0xf] %vm1889_vm9, %v2374_v35  ;;  %v2372_v8 = vpack.c.bf16 %v1475_v6, %v1475_v6  ;;  %v1486_v9 = vadd.f32 %v2659_v45, %v3475_v7 }
 0x227   : > { %v1477_v34 = vpop.f32.mrf.mxu1 }
 0x228   : > { %1914 = vst.msk [vmem:[%s3044_s29 + $0x60] sm:$0xf] %vm1889_vm9, %v2372_v8  ;;  %v2375_v11 = vpack.c.bf16 %v1486_v9, %v1486_v9  ;;  %v1478_v44 = vadd.f32 %v3475_v7, %v1477_v34 }
 0x229   : > { %v2662_v12 = vpop.f32.mrf.mxu1 }
 0x22a   : > { %1917 = vst.msk [vmem:[%s3044_s29 + $0x6c] sm:$0xf] %vm1889_vm9, %v2375_v11  ;;  %v2373_v13 = vpack.c.bf16 %v1478_v44, %v1478_v44  ;;  %v1499_v14 = vadd.f32 %v2662_v12, %v3475_v7 }
 0x22b   : > { %v1490_v15 = vpop.f32.mrf.mxu1 }
 0x22c   : > { %1915 = vst.msk [vmem:[%s3044_s29 + $0x64] sm:$0xf] %vm1889_vm9, %v2373_v13  ;;  %v2378_v16 = vpack.c.bf16 %v1499_v14, %v1499_v14  ;;  %v1491_v17 = vadd.f32 %v3475_v7, %v1490_v15 }
 0x22d   : > { %v2663_v33 = vpop.f32.mrf.mxu1 }
 0x22e   : > { %1920 = vst.msk [vmem:[%s3044_s29 + $0x78] sm:$0xf] %vm1889_vm9, %v2378_v16  ;;  %v2376_v18 = vpack.c.bf16 %v1491_v17, %v1491_v17  ;;  %v1502_v43 = vadd.f32 %v2663_v33, %v3475_v7 }
 0x22f   : > { %v1493_v19 = vpop.f32.mrf.mxu1 }
 0x230   : > { %1918 = vst.msk [vmem:[%s3044_s29 + $0x70] sm:$0xf] %vm1889_vm9, %v2376_v18  ;;  %v2379_v20 = vpack.c.bf16 %v1502_v43, %v1502_v43  ;;  %v1494_v21 = vadd.f32 %v3475_v7, %v1493_v19 }
 0x231   : > { %v2666_v22 = vpop.f32.mrf.mxu1 }
 0x232   : > { %1921 = vst.msk [vmem:[%s3044_s29 + $0x7c] sm:$0xf] %vm1889_vm9, %v2379_v20  ;;  %v2377_v23 = vpack.c.bf16 %v1494_v21, %v1494_v21  ;;  %v1515_v24 = vadd.f32 %v2666_v22, %v3475_v7 }
 0x233   : > { %v1506_v31 = vpop.f32.mrf.mxu1 }
 0x234   : > { %1919 = vst.msk [vmem:[%s3044_s29 + $0x74] sm:$0xf] %vm1889_vm9, %v2377_v23  ;;  %v2382_v25 = vpack.c.bf16 %v1515_v24, %v1515_v24  ;;  %v1507_v26 = vadd.f32 %v3475_v7, %v1506_v31 }
 0x235   : > { %v2667_v27 = vpop.f32.mrf.mxu1 }
 0x236   : > { %1924 = vst.msk [vmem:[%s3044_s29 + $0x88] sm:$0xf] %vm1889_vm9, %v2382_v25  ;;  %v2380_v28 = vpack.c.bf16 %v1507_v26, %v1507_v26  ;;  %v1518_v29 = vadd.f32 %v2667_v27, %v3475_v7 }
 0x237   : > { %v1509_v30 = vpop.f32.mrf.mxu1 }
 0x238   : > { %1922 = vst.msk [vmem:[%s3044_s29 + $0x80] sm:$0xf] %vm1889_vm9, %v2380_v28  ;;  %v2383_v32 = vpack.c.bf16 %v1518_v29, %v1518_v29  ;;  %v1510_v36 = vadd.f32 %v3475_v7, %v1509_v30 }
 0x239   : > { %v2670_v38 = vpop.f32.mrf.mxu1 }
 0x23a   : > { %1925 = vst.msk [vmem:[%s3044_s29 + $0x8c] sm:$0xf] %vm1889_vm9, %v2383_v32  ;;  %v2381_v39 = vpack.c.bf16 %v1510_v36, %v1510_v36  ;;  %v1531_v42 = vadd.f32 %v2670_v38, %v3475_v7 }
 0x23b   : > { %v1522_v49 = vpop.f32.mrf.mxu1 }
 0x23c   : > { %1923 = vst.msk [vmem:[%s3044_s29 + $0x84] sm:$0xf] %vm1889_vm9, %v2381_v39  ;;  %v2386_v41 = vpack.c.bf16 %v1531_v42, %v1531_v42  ;;  %v1523_v50 = vadd.f32 %v3475_v7, %v1522_v49 }
 0x23d   : > { %v2671_v48 = vpop.f32.mrf.mxu1 }
 0x23e   : > { %1928 = vst.msk [vmem:[%s3044_s29 + $0x98] sm:$0xf] %vm1889_vm9, %v2386_v41  ;;  %v2384_v52 = vpack.c.bf16 %v1523_v50, %v1523_v50  ;;  %v1534_v53 = vadd.f32 %v2671_v48, %v3475_v7 }
 0x23f   : > { %v1525_v54 = vpop.f32.mrf.mxu1 }
 0x240   : > { %1926 = vst.msk [vmem:[%s3044_s29 + $0x90] sm:$0xf] %vm1889_vm9, %v2384_v52  ;;  %v2387_v55 = vpack.c.bf16 %v1534_v53, %v1534_v53  ;;  %v1526_v56 = vadd.f32 %v3475_v7, %v1525_v54 }
 0x241   : > { %v2674_v58 = vpop.f32.mrf.mxu1 }
 0x242   : > { %1929 = vst.msk [vmem:[%s3044_s29 + $0x9c] sm:$0xf] %vm1889_vm9, %v2387_v55  ;;  %v2385_v57 = vpack.c.bf16 %v1526_v56, %v1526_v56  ;;  %v1547_v40 = vadd.f32 %v2674_v58, %v3475_v7 }
 0x243   : > { %v1538_v59 = vpop.f32.mrf.mxu1 }
 0x244   : > { %1927 = vst.msk [vmem:[%s3044_s29 + $0x94] sm:$0xf] %vm1889_vm9, %v2385_v57  ;;  %v2390_v47 = vpack.c.bf16 %v1547_v40, %v1547_v40  ;;  %v1539_v60 = vadd.f32 %v3475_v7, %v1538_v59 }
 0x245   : > { %v2675_v61 = vpop.f32.mrf.mxu1 }
 0x246   : > { %1932 = vst.msk [vmem:[%s3044_s29 + $0xa8] sm:$0xf] %vm1889_vm9, %v2390_v47  ;;  %v2388_v10 = vpack.c.bf16 %v1539_v60, %v1539_v60  ;;  %v1550_v3 = vadd.f32 %v2675_v61, %v3475_v7 }
 0x247   : > { %v1541_v37 = vpop.f32.mrf.mxu1 }
 0x248   : > { %1930 = vst.msk [vmem:[%s3044_s29 + $0xa0] sm:$0xf] %vm1889_vm9, %v2388_v10  ;;  %v2391_v62 = vpack.c.bf16 %v1550_v3, %v1550_v3  ;;  %v1542_v46 = vadd.f32 %v3475_v7, %v1541_v37 }
 0x249   : > { %v2678_v63 = vpop.f32.mrf.mxu1 }
 0x24a   : > { %1933 = vst.msk [vmem:[%s3044_s29 + $0xac] sm:$0xf] %vm1889_vm9, %v2391_v62  ;;  %v2389_v0 = vpack.c.bf16 %v1542_v46, %v1542_v46  ;;  %v1563_v1 = vadd.f32 %v2678_v63, %v3475_v7 }
 0x24b   : > { %v1554_v2 = vpop.f32.mrf.mxu1 }
 0x24c   : > { %1931 = vst.msk [vmem:[%s3044_s29 + $0xa4] sm:$0xf] %vm1889_vm9, %v2389_v0  ;;  %v2394_v4 = vpack.c.bf16 %v1563_v1, %v1563_v1  ;;  %v1555_v5 = vadd.f32 %v3475_v7, %v1554_v2  ;;  %v1985_v1 = vld [vmem:[%s3046_s21] sm:$0xff] }
 0x24d   : > { %v2679_v35 = vpop.f32.mrf.mxu1 }
 0x24e   : > { %1936 = vst.msk [vmem:[%s3044_s29 + $0xb8] sm:$0xf] %vm1889_vm9, %v2394_v4  ;;  %v2392_v6 = vpack.c.bf16 %v1555_v5, %v1555_v5  ;;  %v1566_v45 = vadd.f32 %v2679_v35, %v3475_v7 }
 0x24f   : > { %v1557_v8 = vpop.f32.mrf.mxu1 }
 0x250   : > { %1934 = vst.msk [vmem:[%s3044_s29 + $0xb0] sm:$0xf] %vm1889_vm9, %v2392_v6  ;;  %v2395_v9 = vpack.c.bf16 %v1566_v45, %v1566_v45  ;;  %v1558_v34 = vadd.f32 %v3475_v7, %v1557_v8 }
 0x251   : > { %v2682_v11 = vpop.f32.mrf.mxu1 }
 0x252   : > { %1937 = vst.msk [vmem:[%s3044_s29 + $0xbc] sm:$0xf] %vm1889_vm9, %v2395_v9  ;;  %v2393_v44 = vpack.c.bf16 %v1558_v34, %v1558_v34  ;;  %v1579_v12 = vadd.f32 %v2682_v11, %v3475_v7 }
 0x253   : > { %v1570_v13 = vpop.f32.mrf.mxu1 }
 0x254   : > { %1935 = vst.msk [vmem:[%s3044_s29 + $0xb4] sm:$0xf] %vm1889_vm9, %v2393_v44  ;;  %v2398_v14 = vpack.c.bf16 %v1579_v12, %v1579_v12  ;;  %v1571_v15 = vadd.f32 %v3475_v7, %v1570_v13 }
 0x255   : > { %v2683_v16 = vpop.f32.mrf.mxu1 }
 0x256   : > { %1940 = vst.msk [vmem:[%s3044_s29 + $0xc8] sm:$0xf] %vm1889_vm9, %v2398_v14  ;;  %v2396_v17 = vpack.c.bf16 %v1571_v15, %v1571_v15  ;;  %v1582_v33 = vadd.f32 %v2683_v16, %v3475_v7 }
 0x257   : > { %v1573_v18 = vpop.f32.mrf.mxu1 }
 0x258   : > { %1938 = vst.msk [vmem:[%s3044_s29 + $0xc0] sm:$0xf] %vm1889_vm9, %v2396_v17  ;;  %v2399_v43 = vpack.c.bf16 %v1582_v33, %v1582_v33  ;;  %v1574_v19 = vadd.f32 %v3475_v7, %v1573_v18 }
 0x259   : > { %v2686_v20 = vpop.f32.mrf.mxu1 }
 0x25a   : > { %1941 = vst.msk [vmem:[%s3044_s29 + $0xcc] sm:$0xf] %vm1889_vm9, %v2399_v43  ;;  %v2397_v21 = vpack.c.bf16 %v1574_v19, %v1574_v19  ;;  %v1595_v22 = vadd.f32 %v2686_v20, %v3475_v7 }
 0x25b   : > { %v1586_v23 = vpop.f32.mrf.mxu1 }
 0x25c   : > { %1939 = vst.msk [vmem:[%s3044_s29 + $0xc4] sm:$0xf] %vm1889_vm9, %v2397_v21  ;;  %v2402_v24 = vpack.c.bf16 %v1595_v22, %v1595_v22  ;;  %v1587_v31 = vadd.f32 %v3475_v7, %v1586_v23 }
 0x25d   : > { %v2687_v25 = vpop.f32.mrf.mxu1 }
 0x25e   : > { %1944 = vst.msk [vmem:[%s3044_s29 + $0xd8] sm:$0xf] %vm1889_vm9, %v2402_v24  ;;  %v2400_v26 = vpack.c.bf16 %v1587_v31, %v1587_v31  ;;  %v1598_v27 = vadd.f32 %v2687_v25, %v3475_v7 }
 0x25f   : > { %v1589_v28 = vpop.f32.mrf.mxu1 }
 0x260   : > { %1942 = vst.msk [vmem:[%s3044_s29 + $0xd0] sm:$0xf] %vm1889_vm9, %v2400_v26  ;;  %v2403_v29 = vpack.c.bf16 %v1598_v27, %v1598_v27  ;;  %v1590_v30 = vadd.f32 %v3475_v7, %v1589_v28 }
 0x261   : > { %v2690_v32 = vpop.f32.mrf.mxu1 }
 0x262   : > { %1945 = vst.msk [vmem:[%s3044_s29 + $0xdc] sm:$0xf] %vm1889_vm9, %v2403_v29  ;;  %v2401_v36 = vpack.c.bf16 %v1590_v30, %v1590_v30  ;;  %v1611_v38 = vadd.f32 %v2690_v32, %v3475_v7 }
 0x263   : > { %v1602_v39 = vpop.f32.mrf.mxu1 }
 0x264   : > { %1943 = vst.msk [vmem:[%s3044_s29 + $0xd4] sm:$0xf] %vm1889_vm9, %v2401_v36  ;;  %v2406_v42 = vpack.c.bf16 %v1611_v38, %v1611_v38  ;;  %v1603_v49 = vadd.f32 %v3475_v7, %v1602_v39 }
 0x265   : > { %v2691_v41 = vpop.f32.mrf.mxu1 }
 0x266   : > { %1948 = vst.msk [vmem:[%s3044_s29 + $0xe8] sm:$0xf] %vm1889_vm9, %v2406_v42  ;;  %v2404_v50 = vpack.c.bf16 %v1603_v49, %v1603_v49  ;;  %v1614_v48 = vadd.f32 %v2691_v41, %v3475_v7 }
 0x267   : > { %v1605_v52 = vpop.f32.mrf.mxu1 }
 0x268   : > { %1946 = vst.msk [vmem:[%s3044_s29 + $0xe0] sm:$0xf] %vm1889_vm9, %v2404_v50  ;;  %v2407_v53 = vpack.c.bf16 %v1614_v48, %v1614_v48  ;;  %v1606_v54 = vadd.f32 %v3475_v7, %v1605_v52 }
 0x269   : > { %v2694_v55 = vpop.f32.mrf.mxu1 }
 0x26a   : > { %1949 = vst.msk [vmem:[%s3044_s29 + $0xec] sm:$0xf] %vm1889_vm9, %v2407_v53  ;;  %v2405_v56 = vpack.c.bf16 %v1606_v54, %v1606_v54  ;;  %v1627_v58 = vadd.f32 %v2694_v55, %v3475_v7 }
 0x26b   : > { %v1618_v57 = vpop.f32.mrf.mxu1 }
 0x26c   : > { %1947 = vst.msk [vmem:[%s3044_s29 + $0xe4] sm:$0xf] %vm1889_vm9, %v2405_v56  ;;  %v2410_v40 = vpack.c.bf16 %v1627_v58, %v1627_v58  ;;  %v1619_v59 = vadd.f32 %v3475_v7, %v1618_v57 }
 0x26d   : > { %v2695_v47 = vpop.f32.mrf.mxu1 }
 0x26e   : > { %1952 = vst.msk [vmem:[%s3044_s29 + $0xf8] sm:$0xf] %vm1889_vm9, %v2410_v40  ;;  %v2408_v60 = vpack.c.bf16 %v1619_v59, %v1619_v59  ;;  %v1630_v61 = vadd.f32 %v2695_v47, %v3475_v7 }
 0x26f   : > { %v1621_v10 = vpop.f32.mrf.mxu1 }
 0x270   : > { %1950 = vst.msk [vmem:[%s3044_s29 + $0xf0] sm:$0xf] %vm1889_vm9, %v2408_v60  ;;  %v2411_v3 = vpack.c.bf16 %v1630_v61, %v1630_v61  ;;  %v1622_v37 = vadd.f32 %v3475_v7, %v1621_v10 }
 0x271   : > { %v2530_v62 = vpop.f32.mrf.mxu1 }
 0x272   : > { %1953 = vst.msk [vmem:[%s3044_s29 + $0xfc] sm:$0xf] %vm1889_vm9, %v2411_v3  ;;  %v2409_v46 = vpack.c.bf16 %v1622_v37, %v1622_v37 }
 0x273   : > { %v2531_v63 = vpop.f32.mrf.mxu1 }
 0x274   : > { %1951 = vst.msk [vmem:[%s3044_s29 + $0xf4] sm:$0xf] %vm1889_vm9, %v2409_v46  ;;  %v2532_v0 = vadd.f32 %v2531_v63, %v2530_v62  ;;  %s2915_s29 = smov [#allocation3]  }
 0x275   : > { %v2533_v2 = vpop.f32.mrf.mxu1  ;;  %s2822_s28 = sshll.u32 %s2915_s29, 4  ;;  %s2823_s28 = int_to_ptr.vmem [resolvable:$false] %s2822_s28 }
 0x276   : > { %v2061_v4 = vadd.f32 %v2532_v0, %v3478_v51  ;;  %s2824_s11 = scalar_lea.vmem %s2823_s28, 256  ;;  %p2825_p5 = scmp.lt.s32.totalorder %s2096_s23, %s2823_s28 }
 0x277   : > { %v2534_v5 = vpop.f32.mrf.mxu1  ;;  %p2826_p6 = scmp.lt.s32.totalorder %s2824_s11, %s2818_s27 }
 0x278   : > { %v2066_v35 = vadd.f32 %v2061_v4, %v1985_v1 }
 0x279   : > { %p2827_p7 = por %p2826_p6, %p2825_p5 }
 0x27a   : > { %2067 = vst [vmem:[%s3046_s21] sm:$0xff] %v2066_v35 }
 0x27b   : > { %p2828_p8 = pnand %p2827_p7, %p2821_p4 }
 0x27d   : > { %2831 = shalt.err (!%p2828_p8)
}
 0x27e   : > { %s2832_s12 = scalar_lea.hbm %s2093_s16, 128  ;;  %s2836_s22 = scalar_lea.hbm %s3728_s7, 256 }
 0x27f   : > { %p2833_p10 = scmp.ne.s32.totalorder %s2093_s16, %s2832_s12  ;;  %p2837_p13 = scmp.lt.s32.totalorder %s2093_s16, %s3728_s7 }
 0x280   : > { %p2838_p0 = scmp.lt.s32.totalorder %s2836_s22, %s2832_s12 }
 0x281   : > { %p2834_p11 = pnand %p2833_p10, %p3005_p3 }
 0x282   : > { %p2839_p1 = por %p2838_p0, %p2837_p13 }
 0x283   : > { %p2835_p12 = pneg %p2834_p11 }
 0x285   : > { %p2840_p2 = pnand %p2839_p1, %p2835_p12 }
 0x287   : > { %2843 = shalt.err (!%p2840_p2)
}
 0x288   : > { %2696 = dma.vmem_to_hbm [thread:$0]  (%p3005_p3), %s2096_s23, 128, %s2093_s16, %s2076_s30  }
 0x289 PF: > { %p2702_p4 = scmp.ge.s32.totalorder %s2910_s8, 2  ;;  %s2117_s9 = sand.u32 1, %s2882_s24  }
 0x28a   : > { %s2118_s10 = scalar_lea.sflag [#allocation4], %s2117_s9 }
 0x28b   : > { %p2699_p5 = pnand %p2702_p4, %p3015_p9 }
 0x28d   : > { %p2700_p6 = pneg %p2699_p5 }
 0x28f   : > { %2877 = dma.done.wait (%p2700_p6), %s2118_s10, 128  }
 0x290   : > { %2879 = vsyncadd (%p2700_p6), %s2118_s10, 4294967168  ;;  %s21_s8 = sadd.s32 1, %s2910_s8   ;;  %s3740_s27 = sld [smem:[#allocation6_spill]] }
 0x291   : > { %p18_p7 = scmp.ge.s32.totalorder %s21_s8, 6   ;;  %s3741_s28 = sld [smem:[#allocation7_spill]] }
 0x292   : > { %s3742_s29 = sld [smem:[#allocation8_spill]]  ;;  %s3744_s24 = smov %s2886_s25 }
 0x293   : > { %s3743_s30 = sld [smem:[#allocation9_spill]]  ;;  %s3745_s25 = smov %s2890_s26 }
 0x294   : > { %s3746_s26 = smov %s3023_s17  ;;  %20 = sbr.rel (!%p18_p7) target bundleno = 5 (0x5), region = 98 }
 0x299   :  { %2123 = vsyncpa [#allocation4], 1 }
 0x29a   :  { %2125 = vsyncpa [#allocation4 + $0x1], 1 }

</bundles_post_ra>
